<compile_context>
chip_gen: v7x
topology: tpu7x:2x2x1
jax: 0.10.0
libtpu: 0.0.40
codegen_flags: <defaults>
</compile_context>

<pallas_src>
import functools

import jax
import jax.numpy as jnp
from jax.experimental import pallas as pl
from jax.experimental.pallas import tpu as pltpu


# ------------------------------ fused kernel ---------------------------------
def _fused_kernel(num_lstm, num_fc, T, BT, H, use_bf16, *refs):
    """refs = (x, [w_ih, w_hh, b]*num_lstm, [w, b]*num_fc, out, xg_scr[, hseq_scr]).

    x is the time-major block (T, BT, input_size) for this batch tile.
    """
    n_params = 3 * num_lstm + 2 * num_fc
    x_ref = refs[0]
    p = refs[1:1 + n_params]
    out_ref = refs[1 + n_params]
    xg_scr = refs[2 + n_params]                                # (T*BT, 4H)
    hseq_scr = refs[3 + n_params] if num_lstm > 1 else None    # (T*BT, H)

    mxu_dtype = jnp.bfloat16 if use_bf16 else jnp.float32

    # Gate-lane masks, computed once (hoisted out of all loops).
    # Gate order [i, f, g, o]; only g uses tanh, the rest use sigmoid.
    # sigmoid(x) = 0.5 * tanh(0.5 * x) + 0.5  ->  ONE EUP pass per step:
    #   act = tanh(gates * pre) * pre + post
    lane = jax.lax.broadcasted_iota(jnp.int32, (BT, 4 * H), 1)
    is_g = (lane >= 2 * H) & (lane < 3 * H)
    pre = jnp.where(is_g, 1.0, 0.5).astype(jnp.float32)
    post = jnp.where(is_g, 0.0, 0.5).astype(jnp.float32)

    h = None
    for l in range(num_lstm):
        w_ih = p[3 * l][...].astype(mxu_dtype)        # (D, 4H), cast once/layer
        w_hh = p[3 * l + 1][...].astype(mxu_dtype)    # (H, 4H), cast once/layer
        b = p[3 * l + 2][...]                          # (1, 4H), f32

        # Hoisted input projection for all T timesteps, materialized into VMEM
        # scratch so the unrolled recurrence does not carry it as live vregs.
        if l == 0:
            # x_ref is (T, BT, I); a static leading index per step avoids any
            # 3D->2D reshape having to lower in Mosaic.
            for t in range(T):
                xg_scr[t * BT:(t + 1) * BT, :] = (
                    jnp.dot(x_ref[t].astype(mxu_dtype), w_ih,
                            preferred_element_type=jnp.float32) + b)
        else:
            # TODO(synk): inter-layer dropout (inference) is identity.
            xg_scr[...] = (
                jnp.dot(hseq_scr[...].astype(mxu_dtype), w_ih,
                        preferred_element_type=jnp.float32) + b)

        h = jnp.zeros((BT, H), jnp.float32)
        c = jnp.zeros((BT, H), jnp.float32)
        for t in range(T):                             # fully unrolled; T static
            # TODO(synk): keep W_hh resident in the MXU across the T steps via
            # pltpu.matmul_push_rhs / matmul_acc_lhs / matmul_pop (v5e/v6e win).
            gates = xg_scr[t * BT:(t + 1) * BT, :] + jnp.dot(
                h.astype(mxu_dtype), w_hh, preferred_element_type=jnp.float32)
            th = jnp.tanh(gates * pre)                 # single EUP pass, 4H wide
            act = th * pre + post                      # VALU fixup -> sigmoid i/f/o
            # TODO(synk): with H a multiple of 128 these slices / stores become
            # lane-dense; at H=32 they are masked but correct.
            i_g = act[:, 0 * H:1 * H]
            f_g = act[:, 1 * H:2 * H]
            g_g = act[:, 2 * H:3 * H]
            o_g = act[:, 3 * H:4 * H]
            c = f_g * c + i_g * g_g
            h = o_g * jnp.tanh(c)
            if l < num_lstm - 1:
                hseq_scr[t * BT:(t + 1) * BT, :] = h

    # FC head on the last timestep's hidden state of the last layer (kept f32:
    # tiny, off the serial chain, preserves output precision).
    z = h                                              # (BT, H)
    off = 3 * num_lstm
    for li in range(num_fc):
        w = p[off + 2 * li][...]
        bias = p[off + 2 * li + 1][...]
        z = jnp.dot(z, w, preferred_element_type=jnp.float32) + bias
        if li < num_fc - 1:
            z = jnp.maximum(z, 0.0)                    # ReLU (dropout = identity)
    out_ref[...] = z                                   # (BT, out_dim)


# ------------------------------- wrapper --------------------------------------
def lstm_classifier_forward(x_bti, lstm_params, fc_params, *,
                            use_bf16_mxu=True, batch_tile=8):
    """x_bti: (B, T, input_size), batch_first like the PyTorch module."""
    B, T, I = x_bti.shape
    H = lstm_params[0][1].shape[0]
    out_dim = fc_params[-1][0].shape[1]

    BT = min(batch_tile, B)
    # TODO(synk): pad B to a multiple of the 8-row sublane tile instead of
    # asserting, if ragged batch sizes are needed.
    assert B % BT == 0, (B, BT)

    # Batch-first -> time-major (one tiny XLA transpose; flatten + matmul happen
    # inside the kernel).
    # TODO(synk): at production T*B*I read the batch-first array directly via a
    # per-timestep index_map instead of paying this HBM transpose.
    x_tbi = jnp.swapaxes(x_bti, 0, 1)                  # (T, B, I)

    flat = []
    for (w_ih, w_hh, b) in lstm_params:
        flat.extend([w_ih, w_hh, b])
    for (w, b) in fc_params:
        flat.extend([w, b])

    kernel = functools.partial(
        _fused_kernel, len(lstm_params), len(fc_params), T, BT, H,
        bool(use_bf16_mxu))

    in_specs = [pl.BlockSpec((T, BT, I), lambda j: (0, j, 0))]
    # All parameters are small 2D arrays: fully resident, same block every step.
    in_specs += [pl.BlockSpec(a.shape, lambda j: (0, 0)) for a in flat]

    # VMEM scratch: hoisted projection + (optionally) inter-layer hidden seq.
    # TODO(synk): at production T/B/H this all-resident layout must be
    # time-chunked (grid axis marked "arbitrary" + vmem_limit_bytes) to fit
    # v7x's 64 MiB VMEM.
    scratch_shapes = [pltpu.VMEM((T * BT, 4 * H), jnp.float32)]
    if len(lstm_params) > 1:
        scratch_shapes.append(pltpu.VMEM((T * BT, H), jnp.float32))

    return pl.pallas_call(
        kernel,
        out_shape=jax.ShapeDtypeStruct((B, out_dim), jnp.float32),
        grid=(B // BT,),
        in_specs=in_specs,
        out_specs=pl.BlockSpec((BT, out_dim), lambda j: (j, 0)),
        scratch_shapes=scratch_shapes,
        compiler_params=pltpu.CompilerParams(
            dimension_semantics=("parallel",)),
    )(x_tbi, *flat)


# --------------------------- pure-JAX reference --------------------------------
def _reference_forward(x_bti, lstm_params, fc_params):
    h_seq = x_bti
    for (w_ih, w_hh, b) in lstm_params:
        B = h_seq.shape[0]
        H = w_hh.shape[0]

        def step(carry, xt):
            h, c = carry
            gates = xt @ w_ih + h @ w_hh + b[0]
            i = jax.nn.sigmoid(gates[:, :H])
            f = jax.nn.sigmoid(gates[:, H:2 * H])
            g = jnp.tanh(gates[:, 2 * H:3 * H])
            o = jax.nn.sigmoid(gates[:, 3 * H:])
            c = f * c + i * g
            h = o * jnp.tanh(c)
            return (h, c), h

        init = (jnp.zeros((B, H), jnp.float32), jnp.zeros((B, H), jnp.float32))
        _, hs = jax.lax.scan(step, init, jnp.swapaxes(h_seq, 0, 1))
        h_seq = jnp.swapaxes(hs, 0, 1)
    x = h_seq[:, -1, :]
    for li, (w, b) in enumerate(fc_params):
        x = x @ w + b
        if li < len(fc_params) - 1:
            x = jnp.maximum(x, 0.0)
    return x


# ----------------------------------- main --------------------------------------
if __name__ == "__main__":
    # Small shapes consistent with the nn.Module __init__ (B=16 so the parallel
    # batch grid actually has 2 steps with batch_tile=8).
    B, T = 16, 8
    input_size = 16
    hidden_size = 32
    num_layers = 2
    fc_units = (32, 16)

    key = jax.random.PRNGKey(0)

    def uniform(key, shape, bound):
        return jax.random.uniform(key, shape, jnp.float32, -bound, bound)

    k_bound = 1.0 / jnp.sqrt(hidden_size)

    # LSTM parameters: per layer (W_ih (D,4H), W_hh (H,4H), b (1,4H)).
    lstm_params = []
    in_dim = input_size
    for _ in range(num_layers):
        key, k1, k2, k3 = jax.random.split(key, 4)
        w_ih = uniform(k1, (in_dim, 4 * hidden_size), k_bound)
        w_hh = uniform(k2, (hidden_size, 4 * hidden_size), k_bound)
        b = uniform(k3, (1, 4 * hidden_size), k_bound)   # b_ih + b_hh combined
        lstm_params.append((w_ih, w_hh, b))
        in_dim = hidden_size

    # FC head: Linear(H->32) ReLU, Linear(32->16) ReLU, Linear(16->1).
    fc_params = []
    prev = hidden_size
    for units in list(fc_units) + [1]:
        key, k1, k2 = jax.random.split(key, 3)
        bound = 1.0 / jnp.sqrt(prev)
        fc_params.append((uniform(k1, (prev, units), bound),
                          uniform(k2, (1, units), bound)))
        prev = units

    # Input: (B, T, input_size), batch_first like the PyTorch module.
    key, kx = jax.random.split(key)
    x = jax.random.normal(kx, (B, T, input_size), jnp.float32)

    fwd = jax.jit(lstm_classifier_forward)
    out = jax.block_until_ready(fwd(x, lstm_params, fc_params))
    assert out.shape == (B, 1), out.shape

    ref = _reference_forward(x, lstm_params, fc_params)
    # bf16 MXU operands in the kernel drift slightly from the f32 reference;
    # tolerance loosened accordingly (per review).
    assert jnp.allclose(out, ref, rtol=5e-2, atol=5e-2), (out, ref)

    print("KERNEL_OK")
</pallas_src>

<mosaic_0001>
module attributes {stable_mosaic.version = 11 : i64} {
  func.func @_fused_kernel(%arg0: i32, %arg1: memref<8x8x16xf32, #tpu.memory_space<vmem>>, %arg2: memref<16x128xf32, #tpu.memory_space<vmem>>, %arg3: memref<32x128xf32, #tpu.memory_space<vmem>>, %arg4: memref<1x128xf32, #tpu.memory_space<vmem>>, %arg5: memref<32x128xf32, #tpu.memory_space<vmem>>, %arg6: memref<32x128xf32, #tpu.memory_space<vmem>>, %arg7: memref<1x128xf32, #tpu.memory_space<vmem>>, %arg8: memref<32x32xf32, #tpu.memory_space<vmem>>, %arg9: memref<1x32xf32, #tpu.memory_space<vmem>>, %arg10: memref<32x16xf32, #tpu.memory_space<vmem>>, %arg11: memref<1x16xf32, #tpu.memory_space<vmem>>, %arg12: memref<16x1xf32, #tpu.memory_space<vmem>>, %arg13: memref<1x1xf32, #tpu.memory_space<vmem>>, %arg14: memref<8x1xf32, #tpu.memory_space<vmem>>, %arg15: memref<64x128xf32, #tpu.memory_space<vmem>>, %arg16: memref<64x32xf32, #tpu.memory_space<vmem>>) attributes {dimension_semantics = [#tpu.dimension_semantics<parallel>], iteration_bounds = array<i64: 2>, scalar_prefetch = 0 : i64, scratch_operands = 2 : i64, tpu.core_type = #tpu.core_type<tc>, window_params = [{transform_indices = @transform_0, window_bounds = array<i64: 8, 8, 16>}, {pipeline_mode = #tpu.pipeline_mode<synchronous>, transform_indices = @transform_1, window_bounds = array<i64: 16, 128>}, {pipeline_mode = #tpu.pipeline_mode<synchronous>, transform_indices = @transform_2, window_bounds = array<i64: 32, 128>}, {pipeline_mode = #tpu.pipeline_mode<synchronous>, transform_indices = @transform_3, window_bounds = array<i64: 1, 128>}, {pipeline_mode = #tpu.pipeline_mode<synchronous>, transform_indices = @transform_4, window_bounds = array<i64: 32, 128>}, {pipeline_mode = #tpu.pipeline_mode<synchronous>, transform_indices = @transform_5, window_bounds = array<i64: 32, 128>}, {pipeline_mode = #tpu.pipeline_mode<synchronous>, transform_indices = @transform_6, window_bounds = array<i64: 1, 128>}, {pipeline_mode = #tpu.pipeline_mode<synchronous>, transform_indices = @transform_7, window_bounds = array<i64: 32, 32>}, {pipeline_mode = #tpu.pipeline_mode<synchronous>, transform_indices = @transform_8, window_bounds = array<i64: 1, 32>}, {pipeline_mode = #tpu.pipeline_mode<synchronous>, transform_indices = @transform_9, window_bounds = array<i64: 32, 16>}, {pipeline_mode = #tpu.pipeline_mode<synchronous>, transform_indices = @transform_10, window_bounds = array<i64: 1, 16>}, {pipeline_mode = #tpu.pipeline_mode<synchronous>, transform_indices = @transform_11, window_bounds = array<i64: 16, 1>}, {pipeline_mode = #tpu.pipeline_mode<synchronous>, transform_indices = @transform_12, window_bounds = array<i64: 1, 1>}, {transform_indices = @transform_13, window_bounds = array<i64: 8, 1>}]} {
    %0 = tpu.iota {dimensions = array<i32: 1>} : vector<8x128xi32>
    %c64_i32 = arith.constant 64 : i32
    %1 = vector.broadcast %c64_i32 : i32 to vector<8x128xi32>
    %2 = arith.cmpi sge, %0, %1 : vector<8x128xi32>
    %c96_i32 = arith.constant 96 : i32
    %3 = vector.broadcast %c96_i32 : i32 to vector<8x128xi32>
    %4 = arith.cmpi slt, %0, %3 : vector<8x128xi32>
    %5 = arith.andi %2, %4 : vector<8x128xi1>
    %cst = arith.constant 1.000000e+00 : f32
    %cst_0 = arith.constant 5.000000e-01 : f32
    %6 = vector.broadcast %cst : f32 to vector<8x128xf32>
    %7 = vector.broadcast %cst_0 : f32 to vector<8x128xf32>
    %8 = arith.select %5, %6, %7 : vector<8x128xi1>, vector<8x128xf32>
    %cst_1 = arith.constant 0.000000e+00 : f32
    %cst_2 = arith.constant 5.000000e-01 : f32
    %9 = vector.broadcast %cst_1 : f32 to vector<8x128xf32>
    %10 = vector.broadcast %cst_2 : f32 to vector<8x128xf32>
    %11 = arith.select %5, %9, %10 : vector<8x128xi1>, vector<8x128xf32>
    %c0 = arith.constant 0 : index
    %c0_3 = arith.constant 0 : index
    %12 = vector.load %arg2[%c0, %c0_3] : memref<16x128xf32, #tpu.memory_space<vmem>>, vector<16x128xf32>
    %13 = arith.truncf %12 : vector<16x128xf32> to vector<16x128xbf16>
    %c0_4 = arith.constant 0 : index
    %c0_5 = arith.constant 0 : index
    %14 = vector.load %arg3[%c0_4, %c0_5] : memref<32x128xf32, #tpu.memory_space<vmem>>, vector<32x128xf32>
    %15 = arith.truncf %14 : vector<32x128xf32> to vector<32x128xbf16>
    %c0_6 = arith.constant 0 : index
    %c0_7 = arith.constant 0 : index
    %16 = vector.load %arg4[%c0_6, %c0_7] : memref<1x128xf32, #tpu.memory_space<vmem>>, vector<1x128xf32>
    %c0_8 = arith.constant 0 : index
    %c0_9 = arith.constant 0 : index
    %c0_10 = arith.constant 0 : index
    %17 = vector.load %arg1[%c0_8, %c0_9, %c0_10] : memref<8x8x16xf32, #tpu.memory_space<vmem>>, vector<1x8x16xf32>
    %18 = vector.shape_cast %17 : vector<1x8x16xf32> to vector<8x16xf32>
    %19 = arith.truncf %18 : vector<8x16xf32> to vector<8x16xbf16>
    %cst_11 = arith.constant dense<0.000000e+00> : vector<8x128xf32>
    %20 = tpu.matmul %19, %13, %cst_11 {dimension_numbers = #tpu.dot_dimension_numbers<[1], [0], [0], [1], [0, 0, 1, 1], [], []>} : vector<8x16xbf16>, vector<16x128xbf16>, vector<8x128xf32> -> vector<8x128xf32>
    %21 = vector.broadcast %16 : vector<1x128xf32> to vector<8x128xf32>
    %22 = arith.addf %20, %21 : vector<8x128xf32>
    %c0_12 = arith.constant 0 : index
    %c0_13 = arith.constant 0 : index
    %23 = vector.load %arg15[%c0_12, %c0_13] : memref<64x128xf32, #tpu.memory_space<vmem>>, vector<8x128xf32>
    tpu.vector_store %arg15[%c0_12, %c0_13], %22 {strides = array<i32>} : memref<64x128xf32, #tpu.memory_space<vmem>>, vector<8x128xf32>,
    %c1 = arith.constant 1 : index
    %c0_14 = arith.constant 0 : index
    %c0_15 = arith.constant 0 : index
    %24 = vector.load %arg1[%c1, %c0_14, %c0_15] : memref<8x8x16xf32, #tpu.memory_space<vmem>>, vector<1x8x16xf32>
    %25 = vector.shape_cast %24 : vector<1x8x16xf32> to vector<8x16xf32>
    %26 = arith.truncf %25 : vector<8x16xf32> to vector<8x16xbf16>
    %cst_16 = arith.constant dense<0.000000e+00> : vector<8x128xf32>
    %27 = tpu.matmul %26, %13, %cst_16 {dimension_numbers = #tpu.dot_dimension_numbers<[1], [0], [0], [1], [0, 0, 1, 1], [], []>} : vector<8x16xbf16>, vector<16x128xbf16>, vector<8x128xf32> -> vector<8x128xf32>
    %28 = vector.broadcast %16 : vector<1x128xf32> to vector<8x128xf32>
    %29 = arith.addf %27, %28 : vector<8x128xf32>
    %c8 = arith.constant 8 : index
    %c0_17 = arith.constant 0 : index
    %30 = vector.load %arg15[%c8, %c0_17] : memref<64x128xf32, #tpu.memory_space<vmem>>, vector<8x128xf32>
    tpu.vector_store %arg15[%c8, %c0_17], %29 {strides = array<i32>} : memref<64x128xf32, #tpu.memory_space<vmem>>, vector<8x128xf32>,
    %c2 = arith.constant 2 : index
    %c0_18 = arith.constant 0 : index
    %c0_19 = arith.constant 0 : index
    %31 = vector.load %arg1[%c2, %c0_18, %c0_19] : memref<8x8x16xf32, #tpu.memory_space<vmem>>, vector<1x8x16xf32>
    %32 = vector.shape_cast %31 : vector<1x8x16xf32> to vector<8x16xf32>
    %33 = arith.truncf %32 : vector<8x16xf32> to vector<8x16xbf16>
    %cst_20 = arith.constant dense<0.000000e+00> : vector<8x128xf32>
    %34 = tpu.matmul %33, %13, %cst_20 {dimension_numbers = #tpu.dot_dimension_numbers<[1], [0], [0], [1], [0, 0, 1, 1], [], []>} : vector<8x16xbf16>, vector<16x128xbf16>, vector<8x128xf32> -> vector<8x128xf32>
    %35 = vector.broadcast %16 : vector<1x128xf32> to vector<8x128xf32>
    %36 = arith.addf %34, %35 : vector<8x128xf32>
    %c16 = arith.constant 16 : index
    %c0_21 = arith.constant 0 : index
    %37 = vector.load %arg15[%c16, %c0_21] : memref<64x128xf32, #tpu.memory_space<vmem>>, vector<8x128xf32>
    tpu.vector_store %arg15[%c16, %c0_21], %36 {strides = array<i32>} : memref<64x128xf32, #tpu.memory_space<vmem>>, vector<8x128xf32>,
    %c3 = arith.constant 3 : index
    %c0_22 = arith.constant 0 : index
    %c0_23 = arith.constant 0 : index
    %38 = vector.load %arg1[%c3, %c0_22, %c0_23] : memref<8x8x16xf32, #tpu.memory_space<vmem>>, vector<1x8x16xf32>
    %39 = vector.shape_cast %38 : vector<1x8x16xf32> to vector<8x16xf32>
    %40 = arith.truncf %39 : vector<8x16xf32> to vector<8x16xbf16>
    %cst_24 = arith.constant dense<0.000000e+00> : vector<8x128xf32>
    %41 = tpu.matmul %40, %13, %cst_24 {dimension_numbers = #tpu.dot_dimension_numbers<[1], [0], [0], [1], [0, 0, 1, 1], [], []>} : vector<8x16xbf16>, vector<16x128xbf16>, vector<8x128xf32> -> vector<8x128xf32>
    %42 = vector.broadcast %16 : vector<1x128xf32> to vector<8x128xf32>
    %43 = arith.addf %41, %42 : vector<8x128xf32>
    %c24 = arith.constant 24 : index
    %c0_25 = arith.constant 0 : index
    %44 = vector.load %arg15[%c24, %c0_25] : memref<64x128xf32, #tpu.memory_space<vmem>>, vector<8x128xf32>
    tpu.vector_store %arg15[%c24, %c0_25], %43 {strides = array<i32>} : memref<64x128xf32, #tpu.memory_space<vmem>>, vector<8x128xf32>,
    %c4 = arith.constant 4 : index
    %c0_26 = arith.constant 0 : index
    %c0_27 = arith.constant 0 : index
    %45 = vector.load %arg1[%c4, %c0_26, %c0_27] : memref<8x8x16xf32, #tpu.memory_space<vmem>>, vector<1x8x16xf32>
    %46 = vector.shape_cast %45 : vector<1x8x16xf32> to vector<8x16xf32>
    %47 = arith.truncf %46 : vector<8x16xf32> to vector<8x16xbf16>
    %cst_28 = arith.constant dense<0.000000e+00> : vector<8x128xf32>
    %48 = tpu.matmul %47, %13, %cst_28 {dimension_numbers = #tpu.dot_dimension_numbers<[1], [0], [0], [1], [0, 0, 1, 1], [], []>} : vector<8x16xbf16>, vector<16x128xbf16>, vector<8x128xf32> -> vector<8x128xf32>
    %49 = vector.broadcast %16 : vector<1x128xf32> to vector<8x128xf32>
    %50 = arith.addf %48, %49 : vector<8x128xf32>
    %c32 = arith.constant 32 : index
    %c0_29 = arith.constant 0 : index
    %51 = vector.load %arg15[%c32, %c0_29] : memref<64x128xf32, #tpu.memory_space<vmem>>, vector<8x128xf32>
    tpu.vector_store %arg15[%c32, %c0_29], %50 {strides = array<i32>} : memref<64x128xf32, #tpu.memory_space<vmem>>, vector<8x128xf32>,
    %c5 = arith.constant 5 : index
    %c0_30 = arith.constant 0 : index
    %c0_31 = arith.constant 0 : index
    %52 = vector.load %arg1[%c5, %c0_30, %c0_31] : memref<8x8x16xf32, #tpu.memory_space<vmem>>, vector<1x8x16xf32>
    %53 = vector.shape_cast %52 : vector<1x8x16xf32> to vector<8x16xf32>
    %54 = arith.truncf %53 : vector<8x16xf32> to vector<8x16xbf16>
    %cst_32 = arith.constant dense<0.000000e+00> : vector<8x128xf32>
    %55 = tpu.matmul %54, %13, %cst_32 {dimension_numbers = #tpu.dot_dimension_numbers<[1], [0], [0], [1], [0, 0, 1, 1], [], []>} : vector<8x16xbf16>, vector<16x128xbf16>, vector<8x128xf32> -> vector<8x128xf32>
    %56 = vector.broadcast %16 : vector<1x128xf32> to vector<8x128xf32>
    %57 = arith.addf %55, %56 : vector<8x128xf32>
    %c40 = arith.constant 40 : index
    %c0_33 = arith.constant 0 : index
    %58 = vector.load %arg15[%c40, %c0_33] : memref<64x128xf32, #tpu.memory_space<vmem>>, vector<8x128xf32>
    tpu.vector_store %arg15[%c40, %c0_33], %57 {strides = array<i32>} : memref<64x128xf32, #tpu.memory_space<vmem>>, vector<8x128xf32>,
    %c6 = arith.constant 6 : index
    %c0_34 = arith.constant 0 : index
    %c0_35 = arith.constant 0 : index
    %59 = vector.load %arg1[%c6, %c0_34, %c0_35] : memref<8x8x16xf32, #tpu.memory_space<vmem>>, vector<1x8x16xf32>
    %60 = vector.shape_cast %59 : vector<1x8x16xf32> to vector<8x16xf32>
    %61 = arith.truncf %60 : vector<8x16xf32> to vector<8x16xbf16>
    %cst_36 = arith.constant dense<0.000000e+00> : vector<8x128xf32>
    %62 = tpu.matmul %61, %13, %cst_36 {dimension_numbers = #tpu.dot_dimension_numbers<[1], [0], [0], [1], [0, 0, 1, 1], [], []>} : vector<8x16xbf16>, vector<16x128xbf16>, vector<8x128xf32> -> vector<8x128xf32>
    %63 = vector.broadcast %16 : vector<1x128xf32> to vector<8x128xf32>
    %64 = arith.addf %62, %63 : vector<8x128xf32>
    %c48 = arith.constant 48 : index
    %c0_37 = arith.constant 0 : index
    %65 = vector.load %arg15[%c48, %c0_37] : memref<64x128xf32, #tpu.memory_space<vmem>>, vector<8x128xf32>
    tpu.vector_store %arg15[%c48, %c0_37], %64 {strides = array<i32>} : memref<64x128xf32, #tpu.memory_space<vmem>>, vector<8x128xf32>,
    %c7 = arith.constant 7 : index
    %c0_38 = arith.constant 0 : index
    %c0_39 = arith.constant 0 : index
    %66 = vector.load %arg1[%c7, %c0_38, %c0_39] : memref<8x8x16xf32, #tpu.memory_space<vmem>>, vector<1x8x16xf32>
    %67 = vector.shape_cast %66 : vector<1x8x16xf32> to vector<8x16xf32>
    %68 = arith.truncf %67 : vector<8x16xf32> to vector<8x16xbf16>
    %cst_40 = arith.constant dense<0.000000e+00> : vector<8x128xf32>
    %69 = tpu.matmul %68, %13, %cst_40 {dimension_numbers = #tpu.dot_dimension_numbers<[1], [0], [0], [1], [0, 0, 1, 1], [], []>} : vector<8x16xbf16>, vector<16x128xbf16>, vector<8x128xf32> -> vector<8x128xf32>
    %70 = vector.broadcast %16 : vector<1x128xf32> to vector<8x128xf32>
    %71 = arith.addf %69, %70 : vector<8x128xf32>
    %c56 = arith.constant 56 : index
    %c0_41 = arith.constant 0 : index
    %72 = vector.load %arg15[%c56, %c0_41] : memref<64x128xf32, #tpu.memory_space<vmem>>, vector<8x128xf32>
    tpu.vector_store %arg15[%c56, %c0_41], %71 {strides = array<i32>} : memref<64x128xf32, #tpu.memory_space<vmem>>, vector<8x128xf32>,
    %cst_42 = arith.constant 0.000000e+00 : f32
    %73 = vector.broadcast %cst_42 : f32 to vector<8x32xf32>
    %cst_43 = arith.constant 0.000000e+00 : f32
    %74 = vector.broadcast %cst_43 : f32 to vector<8x32xf32>
    %c0_44 = arith.constant 0 : index
    %c0_45 = arith.constant 0 : index
    %75 = vector.load %arg15[%c0_44, %c0_45] : memref<64x128xf32, #tpu.memory_space<vmem>>, vector<8x128xf32>
    %76 = arith.truncf %73 : vector<8x32xf32> to vector<8x32xbf16>
    %cst_46 = arith.constant dense<0.000000e+00> : vector<8x128xf32>
    %77 = tpu.matmul %76, %15, %cst_46 {dimension_numbers = #tpu.dot_dimension_numbers<[1], [0], [0], [1], [0, 0, 1, 1], [], []>} : vector<8x32xbf16>, vector<32x128xbf16>, vector<8x128xf32> -> vector<8x128xf32>
    %78 = arith.addf %75, %77 : vector<8x128xf32>
    %79 = arith.mulf %78, %8 : vector<8x128xf32>
    %80 = math.tanh %79 : vector<8x128xf32>
    %81 = arith.mulf %80, %8 : vector<8x128xf32>
    %82 = arith.addf %81, %11 : vector<8x128xf32>
    %83 = vector.extract_strided_slice %82 {offsets = [0, 0], sizes = [8, 32], strides = [1, 1]} : vector<8x128xf32> to vector<8x32xf32>
    %84 = vector.extract_strided_slice %82 {offsets = [0, 32], sizes = [8, 32], strides = [1, 1]} : vector<8x128xf32> to vector<8x32xf32>
    %85 = vector.extract_strided_slice %82 {offsets = [0, 64], sizes = [8, 32], strides = [1, 1]} : vector<8x128xf32> to vector<8x32xf32>
    %86 = vector.extract_strided_slice %82 {offsets = [0, 96], sizes = [8, 32], strides = [1, 1]} : vector<8x128xf32> to vector<8x32xf32>
    %87 = arith.mulf %84, %74 : vector<8x32xf32>
    %88 = arith.mulf %83, %85 : vector<8x32xf32>
    %89 = arith.addf %87, %88 : vector<8x32xf32>
    %90 = math.tanh %89 : vector<8x32xf32>
    %91 = arith.mulf %86, %90 : vector<8x32xf32>
    %c0_47 = arith.constant 0 : index
    %c0_48 = arith.constant 0 : index
    %92 = vector.load %arg16[%c0_47, %c0_48] : memref<64x32xf32, #tpu.memory_space<vmem>>, vector<8x32xf32>
    tpu.vector_store %arg16[%c0_47, %c0_48], %91 {strides = array<i32>} : memref<64x32xf32, #tpu.memory_space<vmem>>, vector<8x32xf32>,
    %c8_49 = arith.constant 8 : index
    %c0_50 = arith.constant 0 : index
    %93 = vector.load %arg15[%c8_49, %c0_50] : memref<64x128xf32, #tpu.memory_space<vmem>>, vector<8x128xf32>
    %94 = arith.truncf %91 : vector<8x32xf32> to vector<8x32xbf16>
    %cst_51 = arith.constant dense<0.000000e+00> : vector<8x128xf32>
    %95 = tpu.matmul %94, %15, %cst_51 {dimension_numbers = #tpu.dot_dimension_numbers<[1], [0], [0], [1], [0, 0, 1, 1], [], []>} : vector<8x32xbf16>, vector<32x128xbf16>, vector<8x128xf32> -> vector<8x128xf32>
    %96 = arith.addf %93, %95 : vector<8x128xf32>
    %97 = arith.mulf %96, %8 : vector<8x128xf32>
    %98 = math.tanh %97 : vector<8x128xf32>
    %99 = arith.mulf %98, %8 : vector<8x128xf32>
    %100 = arith.addf %99, %11 : vector<8x128xf32>
    %101 = vector.extract_strided_slice %100 {offsets = [0, 0], sizes = [8, 32], strides = [1, 1]} : vector<8x128xf32> to vector<8x32xf32>
    %102 = vector.extract_strided_slice %100 {offsets = [0, 32], sizes = [8, 32], strides = [1, 1]} : vector<8x128xf32> to vector<8x32xf32>
    %103 = vector.extract_strided_slice %100 {offsets = [0, 64], sizes = [8, 32], strides = [1, 1]} : vector<8x128xf32> to vector<8x32xf32>
    %104 = vector.extract_strided_slice %100 {offsets = [0, 96], sizes = [8, 32], strides = [1, 1]} : vector<8x128xf32> to vector<8x32xf32>
    %105 = arith.mulf %102, %89 : vector<8x32xf32>
    %106 = arith.mulf %101, %103 : vector<8x32xf32>
    %107 = arith.addf %105, %106 : vector<8x32xf32>
    %108 = math.tanh %107 : vector<8x32xf32>
    %109 = arith.mulf %104, %108 : vector<8x32xf32>
    %c8_52 = arith.constant 8 : index
    %c0_53 = arith.constant 0 : index
    %110 = vector.load %arg16[%c8_52, %c0_53] : memref<64x32xf32, #tpu.memory_space<vmem>>, vector<8x32xf32>
    tpu.vector_store %arg16[%c8_52, %c0_53], %109 {strides = array<i32>} : memref<64x32xf32, #tpu.memory_space<vmem>>, vector<8x32xf32>,
    %c16_54 = arith.constant 16 : index
    %c0_55 = arith.constant 0 : index
    %111 = vector.load %arg15[%c16_54, %c0_55] : memref<64x128xf32, #tpu.memory_space<vmem>>, vector<8x128xf32>
    %112 = arith.truncf %109 : vector<8x32xf32> to vector<8x32xbf16>
    %cst_56 = arith.constant dense<0.000000e+00> : vector<8x128xf32>
    %113 = tpu.matmul %112, %15, %cst_56 {dimension_numbers = #tpu.dot_dimension_numbers<[1], [0], [0], [1], [0, 0, 1, 1], [], []>} : vector<8x32xbf16>, vector<32x128xbf16>, vector<8x128xf32> -> vector<8x128xf32>
    %114 = arith.addf %111, %113 : vector<8x128xf32>
    %115 = arith.mulf %114, %8 : vector<8x128xf32>
    %116 = math.tanh %115 : vector<8x128xf32>
    %117 = arith.mulf %116, %8 : vector<8x128xf32>
    %118 = arith.addf %117, %11 : vector<8x128xf32>
    %119 = vector.extract_strided_slice %118 {offsets = [0, 0], sizes = [8, 32], strides = [1, 1]} : vector<8x128xf32> to vector<8x32xf32>
    %120 = vector.extract_strided_slice %118 {offsets = [0, 32], sizes = [8, 32], strides = [1, 1]} : vector<8x128xf32> to vector<8x32xf32>
    %121 = vector.extract_strided_slice %118 {offsets = [0, 64], sizes = [8, 32], strides = [1, 1]} : vector<8x128xf32> to vector<8x32xf32>
    %122 = vector.extract_strided_slice %118 {offsets = [0, 96], sizes = [8, 32], strides = [1, 1]} : vector<8x128xf32> to vector<8x32xf32>
    %123 = arith.mulf %120, %107 : vector<8x32xf32>
    %124 = arith.mulf %119, %121 : vector<8x32xf32>
    %125 = arith.addf %123, %124 : vector<8x32xf32>
    %126 = math.tanh %125 : vector<8x32xf32>
    %127 = arith.mulf %122, %126 : vector<8x32xf32>
    %c16_57 = arith.constant 16 : index
    %c0_58 = arith.constant 0 : index
    %128 = vector.load %arg16[%c16_57, %c0_58] : memref<64x32xf32, #tpu.memory_space<vmem>>, vector<8x32xf32>
    tpu.vector_store %arg16[%c16_57, %c0_58], %127 {strides = array<i32>} : memref<64x32xf32, #tpu.memory_space<vmem>>, vector<8x32xf32>,
    %c24_59 = arith.constant 24 : index
    %c0_60 = arith.constant 0 : index
    %129 = vector.load %arg15[%c24_59, %c0_60] : memref<64x128xf32, #tpu.memory_space<vmem>>, vector<8x128xf32>
    %130 = arith.truncf %127 : vector<8x32xf32> to vector<8x32xbf16>
    %cst_61 = arith.constant dense<0.000000e+00> : vector<8x128xf32>
    %131 = tpu.matmul %130, %15, %cst_61 {dimension_numbers = #tpu.dot_dimension_numbers<[1], [0], [0], [1], [0, 0, 1, 1], [], []>} : vector<8x32xbf16>, vector<32x128xbf16>, vector<8x128xf32> -> vector<8x128xf32>
    %132 = arith.addf %129, %131 : vector<8x128xf32>
    %133 = arith.mulf %132, %8 : vector<8x128xf32>
    %134 = math.tanh %133 : vector<8x128xf32>
    %135 = arith.mulf %134, %8 : vector<8x128xf32>
    %136 = arith.addf %135, %11 : vector<8x128xf32>
    %137 = vector.extract_strided_slice %136 {offsets = [0, 0], sizes = [8, 32], strides = [1, 1]} : vector<8x128xf32> to vector<8x32xf32>
    %138 = vector.extract_strided_slice %136 {offsets = [0, 32], sizes = [8, 32], strides = [1, 1]} : vector<8x128xf32> to vector<8x32xf32>
    %139 = vector.extract_strided_slice %136 {offsets = [0, 64], sizes = [8, 32], strides = [1, 1]} : vector<8x128xf32> to vector<8x32xf32>
    %140 = vector.extract_strided_slice %136 {offsets = [0, 96], sizes = [8, 32], strides = [1, 1]} : vector<8x128xf32> to vector<8x32xf32>
    %141 = arith.mulf %138, %125 : vector<8x32xf32>
    %142 = arith.mulf %137, %139 : vector<8x32xf32>
    %143 = arith.addf %141, %142 : vector<8x32xf32>
    %144 = math.tanh %143 : vector<8x32xf32>
    %145 = arith.mulf %140, %144 : vector<8x32xf32>
    %c24_62 = arith.constant 24 : index
    %c0_63 = arith.constant 0 : index
    %146 = vector.load %arg16[%c24_62, %c0_63] : memref<64x32xf32, #tpu.memory_space<vmem>>, vector<8x32xf32>
    tpu.vector_store %arg16[%c24_62, %c0_63], %145 {strides = array<i32>} : memref<64x32xf32, #tpu.memory_space<vmem>>, vector<8x32xf32>,
    %c32_64 = arith.constant 32 : index
    %c0_65 = arith.constant 0 : index
    %147 = vector.load %arg15[%c32_64, %c0_65] : memref<64x128xf32, #tpu.memory_space<vmem>>, vector<8x128xf32>
    %148 = arith.truncf %145 : vector<8x32xf32> to vector<8x32xbf16>
    %cst_66 = arith.constant dense<0.000000e+00> : vector<8x128xf32>
    %149 = tpu.matmul %148, %15, %cst_66 {dimension_numbers = #tpu.dot_dimension_numbers<[1], [0], [0], [1], [0, 0, 1, 1], [], []>} : vector<8x32xbf16>, vector<32x128xbf16>, vector<8x128xf32> -> vector<8x128xf32>
    %150 = arith.addf %147, %149 : vector<8x128xf32>
    %151 = arith.mulf %150, %8 : vector<8x128xf32>
    %152 = math.tanh %151 : vector<8x128xf32>
    %153 = arith.mulf %152, %8 : vector<8x128xf32>
    %154 = arith.addf %153, %11 : vector<8x128xf32>
    %155 = vector.extract_strided_slice %154 {offsets = [0, 0], sizes = [8, 32], strides = [1, 1]} : vector<8x128xf32> to vector<8x32xf32>
    %156 = vector.extract_strided_slice %154 {offsets = [0, 32], sizes = [8, 32], strides = [1, 1]} : vector<8x128xf32> to vector<8x32xf32>
    %157 = vector.extract_strided_slice %154 {offsets = [0, 64], sizes = [8, 32], strides = [1, 1]} : vector<8x128xf32> to vector<8x32xf32>
    %158 = vector.extract_strided_slice %154 {offsets = [0, 96], sizes = [8, 32], strides = [1, 1]} : vector<8x128xf32> to vector<8x32xf32>
    %159 = arith.mulf %156, %143 : vector<8x32xf32>
    %160 = arith.mulf %155, %157 : vector<8x32xf32>
    %161 = arith.addf %159, %160 : vector<8x32xf32>
    %162 = math.tanh %161 : vector<8x32xf32>
    %163 = arith.mulf %158, %162 : vector<8x32xf32>
    %c32_67 = arith.constant 32 : index
    %c0_68 = arith.constant 0 : index
    %164 = vector.load %arg16[%c32_67, %c0_68] : memref<64x32xf32, #tpu.memory_space<vmem>>, vector<8x32xf32>
    tpu.vector_store %arg16[%c32_67, %c0_68], %163 {strides = array<i32>} : memref<64x32xf32, #tpu.memory_space<vmem>>, vector<8x32xf32>,
    %c40_69 = arith.constant 40 : index
    %c0_70 = arith.constant 0 : index
    %165 = vector.load %arg15[%c40_69, %c0_70] : memref<64x128xf32, #tpu.memory_space<vmem>>, vector<8x128xf32>
    %166 = arith.truncf %163 : vector<8x32xf32> to vector<8x32xbf16>
    %cst_71 = arith.constant dense<0.000000e+00> : vector<8x128xf32>
    %167 = tpu.matmul %166, %15, %cst_71 {dimension_numbers = #tpu.dot_dimension_numbers<[1], [0], [0], [1], [0, 0, 1, 1], [], []>} : vector<8x32xbf16>, vector<32x128xbf16>, vector<8x128xf32> -> vector<8x128xf32>
    %168 = arith.addf %165, %167 : vector<8x128xf32>
    %169 = arith.mulf %168, %8 : vector<8x128xf32>
    %170 = math.tanh %169 : vector<8x128xf32>
    %171 = arith.mulf %170, %8 : vector<8x128xf32>
    %172 = arith.addf %171, %11 : vector<8x128xf32>
    %173 = vector.extract_strided_slice %172 {offsets = [0, 0], sizes = [8, 32], strides = [1, 1]} : vector<8x128xf32> to vector<8x32xf32>
    %174 = vector.extract_strided_slice %172 {offsets = [0, 32], sizes = [8, 32], strides = [1, 1]} : vector<8x128xf32> to vector<8x32xf32>
    %175 = vector.extract_strided_slice %172 {offsets = [0, 64], sizes = [8, 32], strides = [1, 1]} : vector<8x128xf32> to vector<8x32xf32>
    %176 = vector.extract_strided_slice %172 {offsets = [0, 96], sizes = [8, 32], strides = [1, 1]} : vector<8x128xf32> to vector<8x32xf32>
    %177 = arith.mulf %174, %161 : vector<8x32xf32>
    %178 = arith.mulf %173, %175 : vector<8x32xf32>
    %179 = arith.addf %177, %178 : vector<8x32xf32>
    %180 = math.tanh %179 : vector<8x32xf32>
    %181 = arith.mulf %176, %180 : vector<8x32xf32>
    %c40_72 = arith.constant 40 : index
    %c0_73 = arith.constant 0 : index
    %182 = vector.load %arg16[%c40_72, %c0_73] : memref<64x32xf32, #tpu.memory_space<vmem>>, vector<8x32xf32>
    tpu.vector_store %arg16[%c40_72, %c0_73], %181 {strides = array<i32>} : memref<64x32xf32, #tpu.memory_space<vmem>>, vector<8x32xf32>,
    %c48_74 = arith.constant 48 : index
    %c0_75 = arith.constant 0 : index
    %183 = vector.load %arg15[%c48_74, %c0_75] : memref<64x128xf32, #tpu.memory_space<vmem>>, vector<8x128xf32>
    %184 = arith.truncf %181 : vector<8x32xf32> to vector<8x32xbf16>
    %cst_76 = arith.constant dense<0.000000e+00> : vector<8x128xf32>
    %185 = tpu.matmul %184, %15, %cst_76 {dimension_numbers = #tpu.dot_dimension_numbers<[1], [0], [0], [1], [0, 0, 1, 1], [], []>} : vector<8x32xbf16>, vector<32x128xbf16>, vector<8x128xf32> -> vector<8x128xf32>
    %186 = arith.addf %183, %185 : vector<8x128xf32>
    %187 = arith.mulf %186, %8 : vector<8x128xf32>
    %188 = math.tanh %187 : vector<8x128xf32>
    %189 = arith.mulf %188, %8 : vector<8x128xf32>
    %190 = arith.addf %189, %11 : vector<8x128xf32>
    %191 = vector.extract_strided_slice %190 {offsets = [0, 0], sizes = [8, 32], strides = [1, 1]} : vector<8x128xf32> to vector<8x32xf32>
    %192 = vector.extract_strided_slice %190 {offsets = [0, 32], sizes = [8, 32], strides = [1, 1]} : vector<8x128xf32> to vector<8x32xf32>
    %193 = vector.extract_strided_slice %190 {offsets = [0, 64], sizes = [8, 32], strides = [1, 1]} : vector<8x128xf32> to vector<8x32xf32>
    %194 = vector.extract_strided_slice %190 {offsets = [0, 96], sizes = [8, 32], strides = [1, 1]} : vector<8x128xf32> to vector<8x32xf32>
    %195 = arith.mulf %192, %179 : vector<8x32xf32>
    %196 = arith.mulf %191, %193 : vector<8x32xf32>
    %197 = arith.addf %195, %196 : vector<8x32xf32>
    %198 = math.tanh %197 : vector<8x32xf32>
    %199 = arith.mulf %194, %198 : vector<8x32xf32>
    %c48_77 = arith.constant 48 : index
    %c0_78 = arith.constant 0 : index
    %200 = vector.load %arg16[%c48_77, %c0_78] : memref<64x32xf32, #tpu.memory_space<vmem>>, vector<8x32xf32>
    tpu.vector_store %arg16[%c48_77, %c0_78], %199 {strides = array<i32>} : memref<64x32xf32, #tpu.memory_space<vmem>>, vector<8x32xf32>,
    %c56_79 = arith.constant 56 : index
    %c0_80 = arith.constant 0 : index
    %201 = vector.load %arg15[%c56_79, %c0_80] : memref<64x128xf32, #tpu.memory_space<vmem>>, vector<8x128xf32>
    %202 = arith.truncf %199 : vector<8x32xf32> to vector<8x32xbf16>
    %cst_81 = arith.constant dense<0.000000e+00> : vector<8x128xf32>
    %203 = tpu.matmul %202, %15, %cst_81 {dimension_numbers = #tpu.dot_dimension_numbers<[1], [0], [0], [1], [0, 0, 1, 1], [], []>} : vector<8x32xbf16>, vector<32x128xbf16>, vector<8x128xf32> -> vector<8x128xf32>
    %204 = arith.addf %201, %203 : vector<8x128xf32>
    %205 = arith.mulf %204, %8 : vector<8x128xf32>
    %206 = math.tanh %205 : vector<8x128xf32>
    %207 = arith.mulf %206, %8 : vector<8x128xf32>
    %208 = arith.addf %207, %11 : vector<8x128xf32>
    %209 = vector.extract_strided_slice %208 {offsets = [0, 0], sizes = [8, 32], strides = [1, 1]} : vector<8x128xf32> to vector<8x32xf32>
    %210 = vector.extract_strided_slice %208 {offsets = [0, 32], sizes = [8, 32], strides = [1, 1]} : vector<8x128xf32> to vector<8x32xf32>
    %211 = vector.extract_strided_slice %208 {offsets = [0, 64], sizes = [8, 32], strides = [1, 1]} : vector<8x128xf32> to vector<8x32xf32>
    %212 = vector.extract_strided_slice %208 {offsets = [0, 96], sizes = [8, 32], strides = [1, 1]} : vector<8x128xf32> to vector<8x32xf32>
    %213 = arith.mulf %210, %197 : vector<8x32xf32>
    %214 = arith.mulf %209, %211 : vector<8x32xf32>
    %215 = arith.addf %213, %214 : vector<8x32xf32>
    %216 = math.tanh %215 : vector<8x32xf32>
    %217 = arith.mulf %212, %216 : vector<8x32xf32>
    %c56_82 = arith.constant 56 : index
    %c0_83 = arith.constant 0 : index
    %218 = vector.load %arg16[%c56_82, %c0_83] : memref<64x32xf32, #tpu.memory_space<vmem>>, vector<8x32xf32>
    tpu.vector_store %arg16[%c56_82, %c0_83], %217 {strides = array<i32>} : memref<64x32xf32, #tpu.memory_space<vmem>>, vector<8x32xf32>,
    %c0_84 = arith.constant 0 : index
    %c0_85 = arith.constant 0 : index
    %219 = vector.load %arg5[%c0_84, %c0_85] : memref<32x128xf32, #tpu.memory_space<vmem>>, vector<32x128xf32>
    %220 = arith.truncf %219 : vector<32x128xf32> to vector<32x128xbf16>
    %c0_86 = arith.constant 0 : index
    %c0_87 = arith.constant 0 : index
    %221 = vector.load %arg6[%c0_86, %c0_87] : memref<32x128xf32, #tpu.memory_space<vmem>>, vector<32x128xf32>
    %222 = arith.truncf %221 : vector<32x128xf32> to vector<32x128xbf16>
    %c0_88 = arith.constant 0 : index
    %c0_89 = arith.constant 0 : index
    %223 = vector.load %arg7[%c0_88, %c0_89] : memref<1x128xf32, #tpu.memory_space<vmem>>, vector<1x128xf32>
    %c0_90 = arith.constant 0 : index
    %c0_91 = arith.constant 0 : index
    %224 = vector.load %arg16[%c0_90, %c0_91] : memref<64x32xf32, #tpu.memory_space<vmem>>, vector<64x32xf32>
    %225 = arith.truncf %224 : vector<64x32xf32> to vector<64x32xbf16>
    %cst_92 = arith.constant dense<0.000000e+00> : vector<64x128xf32>
    %226 = tpu.matmul %225, %220, %cst_92 {dimension_numbers = #tpu.dot_dimension_numbers<[1], [0], [0], [1], [0, 0, 1, 1], [], []>} : vector<64x32xbf16>, vector<32x128xbf16>, vector<64x128xf32> -> vector<64x128xf32>
    %227 = vector.broadcast %223 : vector<1x128xf32> to vector<64x128xf32>
    %228 = arith.addf %226, %227 : vector<64x128xf32>
    %c0_93 = arith.constant 0 : index
    %c0_94 = arith.constant 0 : index
    %229 = vector.load %arg15[%c0_93, %c0_94] : memref<64x128xf32, #tpu.memory_space<vmem>>, vector<64x128xf32>
    tpu.vector_store %arg15[%c0_93, %c0_94], %228 {strides = array<i32>} : memref<64x128xf32, #tpu.memory_space<vmem>>, vector<64x128xf32>,
    %cst_95 = arith.constant 0.000000e+00 : f32
    %230 = vector.broadcast %cst_95 : f32 to vector<8x32xf32>
    %cst_96 = arith.constant 0.000000e+00 : f32
    %231 = vector.broadcast %cst_96 : f32 to vector<8x32xf32>
    %c0_97 = arith.constant 0 : index
    %c0_98 = arith.constant 0 : index
    %232 = vector.load %arg15[%c0_97, %c0_98] : memref<64x128xf32, #tpu.memory_space<vmem>>, vector<8x128xf32>
    %233 = arith.truncf %230 : vector<8x32xf32> to vector<8x32xbf16>
    %cst_99 = arith.constant dense<0.000000e+00> : vector<8x128xf32>
    %234 = tpu.matmul %233, %222, %cst_99 {dimension_numbers = #tpu.dot_dimension_numbers<[1], [0], [0], [1], [0, 0, 1, 1], [], []>} : vector<8x32xbf16>, vector<32x128xbf16>, vector<8x128xf32> -> vector<8x128xf32>
    %235 = arith.addf %232, %234 : vector<8x128xf32>
    %236 = arith.mulf %235, %8 : vector<8x128xf32>
    %237 = math.tanh %236 : vector<8x128xf32>
    %238 = arith.mulf %237, %8 : vector<8x128xf32>
    %239 = arith.addf %238, %11 : vector<8x128xf32>
    %240 = vector.extract_strided_slice %239 {offsets = [0, 0], sizes = [8, 32], strides = [1, 1]} : vector<8x128xf32> to vector<8x32xf32>
    %241 = vector.extract_strided_slice %239 {offsets = [0, 32], sizes = [8, 32], strides = [1, 1]} : vector<8x128xf32> to vector<8x32xf32>
    %242 = vector.extract_strided_slice %239 {offsets = [0, 64], sizes = [8, 32], strides = [1, 1]} : vector<8x128xf32> to vector<8x32xf32>
    %243 = vector.extract_strided_slice %239 {offsets = [0, 96], sizes = [8, 32], strides = [1, 1]} : vector<8x128xf32> to vector<8x32xf32>
    %244 = arith.mulf %241, %231 : vector<8x32xf32>
    %245 = arith.mulf %240, %242 : vector<8x32xf32>
    %246 = arith.addf %244, %245 : vector<8x32xf32>
    %247 = math.tanh %246 : vector<8x32xf32>
    %248 = arith.mulf %243, %247 : vector<8x32xf32>
    %c8_100 = arith.constant 8 : index
    %c0_101 = arith.constant 0 : index
    %249 = vector.load %arg15[%c8_100, %c0_101] : memref<64x128xf32, #tpu.memory_space<vmem>>, vector<8x128xf32>
    %250 = arith.truncf %248 : vector<8x32xf32> to vector<8x32xbf16>
    %cst_102 = arith.constant dense<0.000000e+00> : vector<8x128xf32>
    %251 = tpu.matmul %250, %222, %cst_102 {dimension_numbers = #tpu.dot_dimension_numbers<[1], [0], [0], [1], [0, 0, 1, 1], [], []>} : vector<8x32xbf16>, vector<32x128xbf16>, vector<8x128xf32> -> vector<8x128xf32>
    %252 = arith.addf %249, %251 : vector<8x128xf32>
    %253 = arith.mulf %252, %8 : vector<8x128xf32>
    %254 = math.tanh %253 : vector<8x128xf32>
    %255 = arith.mulf %254, %8 : vector<8x128xf32>
    %256 = arith.addf %255, %11 : vector<8x128xf32>
    %257 = vector.extract_strided_slice %256 {offsets = [0, 0], sizes = [8, 32], strides = [1, 1]} : vector<8x128xf32> to vector<8x32xf32>
    %258 = vector.extract_strided_slice %256 {offsets = [0, 32], sizes = [8, 32], strides = [1, 1]} : vector<8x128xf32> to vector<8x32xf32>
    %259 = vector.extract_strided_slice %256 {offsets = [0, 64], sizes = [8, 32], strides = [1, 1]} : vector<8x128xf32> to vector<8x32xf32>
    %260 = vector.extract_strided_slice %256 {offsets = [0, 96], sizes = [8, 32], strides = [1, 1]} : vector<8x128xf32> to vector<8x32xf32>
    %261 = arith.mulf %258, %246 : vector<8x32xf32>
    %262 = arith.mulf %257, %259 : vector<8x32xf32>
    %263 = arith.addf %261, %262 : vector<8x32xf32>
    %264 = math.tanh %263 : vector<8x32xf32>
    %265 = arith.mulf %260, %264 : vector<8x32xf32>
    %c16_103 = arith.constant 16 : index
    %c0_104 = arith.constant 0 : index
    %266 = vector.load %arg15[%c16_103, %c0_104] : memref<64x128xf32, #tpu.memory_space<vmem>>, vector<8x128xf32>
    %267 = arith.truncf %265 : vector<8x32xf32> to vector<8x32xbf16>
    %cst_105 = arith.constant dense<0.000000e+00> : vector<8x128xf32>
    %268 = tpu.matmul %267, %222, %cst_105 {dimension_numbers = #tpu.dot_dimension_numbers<[1], [0], [0], [1], [0, 0, 1, 1], [], []>} : vector<8x32xbf16>, vector<32x128xbf16>, vector<8x128xf32> -> vector<8x128xf32>
    %269 = arith.addf %266, %268 : vector<8x128xf32>
    %270 = arith.mulf %269, %8 : vector<8x128xf32>
    %271 = math.tanh %270 : vector<8x128xf32>
    %272 = arith.mulf %271, %8 : vector<8x128xf32>
    %273 = arith.addf %272, %11 : vector<8x128xf32>
    %274 = vector.extract_strided_slice %273 {offsets = [0, 0], sizes = [8, 32], strides = [1, 1]} : vector<8x128xf32> to vector<8x32xf32>
    %275 = vector.extract_strided_slice %273 {offsets = [0, 32], sizes = [8, 32], strides = [1, 1]} : vector<8x128xf32> to vector<8x32xf32>
    %276 = vector.extract_strided_slice %273 {offsets = [0, 64], sizes = [8, 32], strides = [1, 1]} : vector<8x128xf32> to vector<8x32xf32>
    %277 = vector.extract_strided_slice %273 {offsets = [0, 96], sizes = [8, 32], strides = [1, 1]} : vector<8x128xf32> to vector<8x32xf32>
    %278 = arith.mulf %275, %263 : vector<8x32xf32>
    %279 = arith.mulf %274, %276 : vector<8x32xf32>
    %280 = arith.addf %278, %279 : vector<8x32xf32>
    %281 = math.tanh %280 : vector<8x32xf32>
    %282 = arith.mulf %277, %281 : vector<8x32xf32>
    %c24_106 = arith.constant 24 : index
    %c0_107 = arith.constant 0 : index
    %283 = vector.load %arg15[%c24_106, %c0_107] : memref<64x128xf32, #tpu.memory_space<vmem>>, vector<8x128xf32>
    %284 = arith.truncf %282 : vector<8x32xf32> to vector<8x32xbf16>
    %cst_108 = arith.constant dense<0.000000e+00> : vector<8x128xf32>
    %285 = tpu.matmul %284, %222, %cst_108 {dimension_numbers = #tpu.dot_dimension_numbers<[1], [0], [0], [1], [0, 0, 1, 1], [], []>} : vector<8x32xbf16>, vector<32x128xbf16>, vector<8x128xf32> -> vector<8x128xf32>
    %286 = arith.addf %283, %285 : vector<8x128xf32>
    %287 = arith.mulf %286, %8 : vector<8x128xf32>
    %288 = math.tanh %287 : vector<8x128xf32>
    %289 = arith.mulf %288, %8 : vector<8x128xf32>
    %290 = arith.addf %289, %11 : vector<8x128xf32>
    %291 = vector.extract_strided_slice %290 {offsets = [0, 0], sizes = [8, 32], strides = [1, 1]} : vector<8x128xf32> to vector<8x32xf32>
    %292 = vector.extract_strided_slice %290 {offsets = [0, 32], sizes = [8, 32], strides = [1, 1]} : vector<8x128xf32> to vector<8x32xf32>
    %293 = vector.extract_strided_slice %290 {offsets = [0, 64], sizes = [8, 32], strides = [1, 1]} : vector<8x128xf32> to vector<8x32xf32>
    %294 = vector.extract_strided_slice %290 {offsets = [0, 96], sizes = [8, 32], strides = [1, 1]} : vector<8x128xf32> to vector<8x32xf32>
    %295 = arith.mulf %292, %280 : vector<8x32xf32>
    %296 = arith.mulf %291, %293 : vector<8x32xf32>
    %297 = arith.addf %295, %296 : vector<8x32xf32>
    %298 = math.tanh %297 : vector<8x32xf32>
    %299 = arith.mulf %294, %298 : vector<8x32xf32>
    %c32_109 = arith.constant 32 : index
    %c0_110 = arith.constant 0 : index
    %300 = vector.load %arg15[%c32_109, %c0_110] : memref<64x128xf32, #tpu.memory_space<vmem>>, vector<8x128xf32>
    %301 = arith.truncf %299 : vector<8x32xf32> to vector<8x32xbf16>
    %cst_111 = arith.constant dense<0.000000e+00> : vector<8x128xf32>
    %302 = tpu.matmul %301, %222, %cst_111 {dimension_numbers = #tpu.dot_dimension_numbers<[1], [0], [0], [1], [0, 0, 1, 1], [], []>} : vector<8x32xbf16>, vector<32x128xbf16>, vector<8x128xf32> -> vector<8x128xf32>
    %303 = arith.addf %300, %302 : vector<8x128xf32>
    %304 = arith.mulf %303, %8 : vector<8x128xf32>
    %305 = math.tanh %304 : vector<8x128xf32>
    %306 = arith.mulf %305, %8 : vector<8x128xf32>
    %307 = arith.addf %306, %11 : vector<8x128xf32>
    %308 = vector.extract_strided_slice %307 {offsets = [0, 0], sizes = [8, 32], strides = [1, 1]} : vector<8x128xf32> to vector<8x32xf32>
    %309 = vector.extract_strided_slice %307 {offsets = [0, 32], sizes = [8, 32], strides = [1, 1]} : vector<8x128xf32> to vector<8x32xf32>
    %310 = vector.extract_strided_slice %307 {offsets = [0, 64], sizes = [8, 32], strides = [1, 1]} : vector<8x128xf32> to vector<8x32xf32>
    %311 = vector.extract_strided_slice %307 {offsets = [0, 96], sizes = [8, 32], strides = [1, 1]} : vector<8x128xf32> to vector<8x32xf32>
    %312 = arith.mulf %309, %297 : vector<8x32xf32>
    %313 = arith.mulf %308, %310 : vector<8x32xf32>
    %314 = arith.addf %312, %313 : vector<8x32xf32>
    %315 = math.tanh %314 : vector<8x32xf32>
    %316 = arith.mulf %311, %315 : vector<8x32xf32>
    %c40_112 = arith.constant 40 : index
    %c0_113 = arith.constant 0 : index
    %317 = vector.load %arg15[%c40_112, %c0_113] : memref<64x128xf32, #tpu.memory_space<vmem>>, vector<8x128xf32>
    %318 = arith.truncf %316 : vector<8x32xf32> to vector<8x32xbf16>
    %cst_114 = arith.constant dense<0.000000e+00> : vector<8x128xf32>
    %319 = tpu.matmul %318, %222, %cst_114 {dimension_numbers = #tpu.dot_dimension_numbers<[1], [0], [0], [1], [0, 0, 1, 1], [], []>} : vector<8x32xbf16>, vector<32x128xbf16>, vector<8x128xf32> -> vector<8x128xf32>
    %320 = arith.addf %317, %319 : vector<8x128xf32>
    %321 = arith.mulf %320, %8 : vector<8x128xf32>
    %322 = math.tanh %321 : vector<8x128xf32>
    %323 = arith.mulf %322, %8 : vector<8x128xf32>
    %324 = arith.addf %323, %11 : vector<8x128xf32>
    %325 = vector.extract_strided_slice %324 {offsets = [0, 0], sizes = [8, 32], strides = [1, 1]} : vector<8x128xf32> to vector<8x32xf32>
    %326 = vector.extract_strided_slice %324 {offsets = [0, 32], sizes = [8, 32], strides = [1, 1]} : vector<8x128xf32> to vector<8x32xf32>
    %327 = vector.extract_strided_slice %324 {offsets = [0, 64], sizes = [8, 32], strides = [1, 1]} : vector<8x128xf32> to vector<8x32xf32>
    %328 = vector.extract_strided_slice %324 {offsets = [0, 96], sizes = [8, 32], strides = [1, 1]} : vector<8x128xf32> to vector<8x32xf32>
    %329 = arith.mulf %326, %314 : vector<8x32xf32>
    %330 = arith.mulf %325, %327 : vector<8x32xf32>
    %331 = arith.addf %329, %330 : vector<8x32xf32>
    %332 = math.tanh %331 : vector<8x32xf32>
    %333 = arith.mulf %328, %332 : vector<8x32xf32>
    %c48_115 = arith.constant 48 : index
    %c0_116 = arith.constant 0 : index
    %334 = vector.load %arg15[%c48_115, %c0_116] : memref<64x128xf32, #tpu.memory_space<vmem>>, vector<8x128xf32>
    %335 = arith.truncf %333 : vector<8x32xf32> to vector<8x32xbf16>
    %cst_117 = arith.constant dense<0.000000e+00> : vector<8x128xf32>
    %336 = tpu.matmul %335, %222, %cst_117 {dimension_numbers = #tpu.dot_dimension_numbers<[1], [0], [0], [1], [0, 0, 1, 1], [], []>} : vector<8x32xbf16>, vector<32x128xbf16>, vector<8x128xf32> -> vector<8x128xf32>
    %337 = arith.addf %334, %336 : vector<8x128xf32>
    %338 = arith.mulf %337, %8 : vector<8x128xf32>
    %339 = math.tanh %338 : vector<8x128xf32>
    %340 = arith.mulf %339, %8 : vector<8x128xf32>
    %341 = arith.addf %340, %11 : vector<8x128xf32>
    %342 = vector.extract_strided_slice %341 {offsets = [0, 0], sizes = [8, 32], strides = [1, 1]} : vector<8x128xf32> to vector<8x32xf32>
    %343 = vector.extract_strided_slice %341 {offsets = [0, 32], sizes = [8, 32], strides = [1, 1]} : vector<8x128xf32> to vector<8x32xf32>
    %344 = vector.extract_strided_slice %341 {offsets = [0, 64], sizes = [8, 32], strides = [1, 1]} : vector<8x128xf32> to vector<8x32xf32>
    %345 = vector.extract_strided_slice %341 {offsets = [0, 96], sizes = [8, 32], strides = [1, 1]} : vector<8x128xf32> to vector<8x32xf32>
    %346 = arith.mulf %343, %331 : vector<8x32xf32>
    %347 = arith.mulf %342, %344 : vector<8x32xf32>
    %348 = arith.addf %346, %347 : vector<8x32xf32>
    %349 = math.tanh %348 : vector<8x32xf32>
    %350 = arith.mulf %345, %349 : vector<8x32xf32>
    %c56_118 = arith.constant 56 : index
    %c0_119 = arith.constant 0 : index
    %351 = vector.load %arg15[%c56_118, %c0_119] : memref<64x128xf32, #tpu.memory_space<vmem>>, vector<8x128xf32>
    %352 = arith.truncf %350 : vector<8x32xf32> to vector<8x32xbf16>
    %cst_120 = arith.constant dense<0.000000e+00> : vector<8x128xf32>
    %353 = tpu.matmul %352, %222, %cst_120 {dimension_numbers = #tpu.dot_dimension_numbers<[1], [0], [0], [1], [0, 0, 1, 1], [], []>} : vector<8x32xbf16>, vector<32x128xbf16>, vector<8x128xf32> -> vector<8x128xf32>
    %354 = arith.addf %351, %353 : vector<8x128xf32>
    %355 = arith.mulf %354, %8 : vector<8x128xf32>
    %356 = math.tanh %355 : vector<8x128xf32>
    %357 = arith.mulf %356, %8 : vector<8x128xf32>
    %358 = arith.addf %357, %11 : vector<8x128xf32>
    %359 = vector.extract_strided_slice %358 {offsets = [0, 0], sizes = [8, 32], strides = [1, 1]} : vector<8x128xf32> to vector<8x32xf32>
    %360 = vector.extract_strided_slice %358 {offsets = [0, 32], sizes = [8, 32], strides = [1, 1]} : vector<8x128xf32> to vector<8x32xf32>
    %361 = vector.extract_strided_slice %358 {offsets = [0, 64], sizes = [8, 32], strides = [1, 1]} : vector<8x128xf32> to vector<8x32xf32>
    %362 = vector.extract_strided_slice %358 {offsets = [0, 96], sizes = [8, 32], strides = [1, 1]} : vector<8x128xf32> to vector<8x32xf32>
    %363 = arith.mulf %360, %348 : vector<8x32xf32>
    %364 = arith.mulf %359, %361 : vector<8x32xf32>
    %365 = arith.addf %363, %364 : vector<8x32xf32>
    %366 = math.tanh %365 : vector<8x32xf32>
    %367 = arith.mulf %362, %366 : vector<8x32xf32>
    %c0_121 = arith.constant 0 : index
    %c0_122 = arith.constant 0 : index
    %368 = vector.load %arg8[%c0_121, %c0_122] : memref<32x32xf32, #tpu.memory_space<vmem>>, vector<32x32xf32>
    %c0_123 = arith.constant 0 : index
    %c0_124 = arith.constant 0 : index
    %369 = vector.load %arg9[%c0_123, %c0_124] : memref<1x32xf32, #tpu.memory_space<vmem>>, vector<1x32xf32>
    %cst_125 = arith.constant dense<0.000000e+00> : vector<8x32xf32>
    %370 = tpu.matmul %367, %368, %cst_125 {dimension_numbers = #tpu.dot_dimension_numbers<[1], [0], [0], [1], [0, 0, 1, 1], [], []>} : vector<8x32xf32>, vector<32x32xf32>, vector<8x32xf32> -> vector<8x32xf32>
    %371 = vector.broadcast %369 : vector<1x32xf32> to vector<8x32xf32>
    %372 = arith.addf %370, %371 : vector<8x32xf32>
    %cst_126 = arith.constant 0.000000e+00 : f32
    %373 = vector.broadcast %cst_126 : f32 to vector<8x32xf32>
    %374 = arith.maximumf %372, %373 : vector<8x32xf32>
    %c0_127 = arith.constant 0 : index
    %c0_128 = arith.constant 0 : index
    %375 = vector.load %arg10[%c0_127, %c0_128] : memref<32x16xf32, #tpu.memory_space<vmem>>, vector<32x16xf32>
    %c0_129 = arith.constant 0 : index
    %c0_130 = arith.constant 0 : index
    %376 = vector.load %arg11[%c0_129, %c0_130] : memref<1x16xf32, #tpu.memory_space<vmem>>, vector<1x16xf32>
    %cst_131 = arith.constant dense<0.000000e+00> : vector<8x16xf32>
    %377 = tpu.matmul %374, %375, %cst_131 {dimension_numbers = #tpu.dot_dimension_numbers<[1], [0], [0], [1], [0, 0, 1, 1], [], []>} : vector<8x32xf32>, vector<32x16xf32>, vector<8x16xf32> -> vector<8x16xf32>
    %378 = vector.broadcast %376 : vector<1x16xf32> to vector<8x16xf32>
    %379 = arith.addf %377, %378 : vector<8x16xf32>
    %cst_132 = arith.constant 0.000000e+00 : f32
    %380 = vector.broadcast %cst_132 : f32 to vector<8x16xf32>
    %381 = arith.maximumf %379, %380 : vector<8x16xf32>
    %c0_133 = arith.constant 0 : index
    %c0_134 = arith.constant 0 : index
    %382 = vector.load %arg12[%c0_133, %c0_134] : memref<16x1xf32, #tpu.memory_space<vmem>>, vector<16x1xf32>
    %c0_135 = arith.constant 0 : index
    %c0_136 = arith.constant 0 : index
    %383 = vector.load %arg13[%c0_135, %c0_136] : memref<1x1xf32, #tpu.memory_space<vmem>>, vector<1x1xf32>
    %cst_137 = arith.constant dense<0.000000e+00> : vector<8x1xf32>
    %384 = tpu.matmul %381, %382, %cst_137 {dimension_numbers = #tpu.dot_dimension_numbers<[1], [0], [0], [1], [0, 0, 1, 1], [], []>} : vector<8x16xf32>, vector<16x1xf32>, vector<8x1xf32> -> vector<8x1xf32>
    %385 = vector.broadcast %383 : vector<1x1xf32> to vector<8x1xf32>
    %386 = arith.addf %384, %385 : vector<8x1xf32>
    %c0_138 = arith.constant 0 : index
    %c0_139 = arith.constant 0 : index
    %387 = vector.load %arg14[%c0_138, %c0_139] : memref<8x1xf32, #tpu.memory_space<vmem>>, vector<8x1xf32>
    tpu.vector_store %arg14[%c0_138, %c0_139], %386 {strides = array<i32>} : memref<8x1xf32, #tpu.memory_space<vmem>>, vector<8x1xf32>,
    return
  }
  func.func @transform_0(%arg0: i32) -> (i32, i32, i32) {
    %c0_i32 = arith.constant 0 : i32
    %c0_i32_0 = arith.constant 0 : i32
    %c0_i32_1 = arith.constant 0 : i32
    return %c0_i32, %arg0, %c0_i32_0 : i32, i32, i32
  }
  func.func @transform_1(%arg0: i32) -> (i32, i32) {
    %c0_i32 = arith.constant 0 : i32
    %c0_i32_0 = arith.constant 0 : i32
    %c0_i32_1 = arith.constant 0 : i32
    return %c0_i32, %c0_i32_0 : i32, i32
  }
  func.func @transform_2(%arg0: i32) -> (i32, i32) {
    %c0_i32 = arith.constant 0 : i32
    %c0_i32_0 = arith.constant 0 : i32
    %c0_i32_1 = arith.constant 0 : i32
    return %c0_i32, %c0_i32_0 : i32, i32
  }
  func.func @transform_3(%arg0: i32) -> (i32, i32) {
    %c0_i32 = arith.constant 0 : i32
    %c0_i32_0 = arith.constant 0 : i32
    %c0_i32_1 = arith.constant 0 : i32
    return %c0_i32, %c0_i32_0 : i32, i32
  }
  func.func @transform_4(%arg0: i32) -> (i32, i32) {
    %c0_i32 = arith.constant 0 : i32
    %c0_i32_0 = arith.constant 0 : i32
    %c0_i32_1 = arith.constant 0 : i32
    return %c0_i32, %c0_i32_0 : i32, i32
  }
  func.func @transform_5(%arg0: i32) -> (i32, i32) {
    %c0_i32 = arith.constant 0 : i32
    %c0_i32_0 = arith.constant 0 : i32
    %c0_i32_1 = arith.constant 0 : i32
    return %c0_i32, %c0_i32_0 : i32, i32
  }
  func.func @transform_6(%arg0: i32) -> (i32, i32) {
    %c0_i32 = arith.constant 0 : i32
    %c0_i32_0 = arith.constant 0 : i32
    %c0_i32_1 = arith.constant 0 : i32
    return %c0_i32, %c0_i32_0 : i32, i32
  }
  func.func @transform_7(%arg0: i32) -> (i32, i32) {
    %c0_i32 = arith.constant 0 : i32
    %c0_i32_0 = arith.constant 0 : i32
    %c0_i32_1 = arith.constant 0 : i32
    return %c0_i32, %c0_i32_0 : i32, i32
  }
  func.func @transform_8(%arg0: i32) -> (i32, i32) {
    %c0_i32 = arith.constant 0 : i32
    %c0_i32_0 = arith.constant 0 : i32
    %c0_i32_1 = arith.constant 0 : i32
    return %c0_i32, %c0_i32_0 : i32, i32
  }
  func.func @transform_9(%arg0: i32) -> (i32, i32) {
    %c0_i32 = arith.constant 0 : i32
    %c0_i32_0 = arith.constant 0 : i32
    %c0_i32_1 = arith.constant 0 : i32
    return %c0_i32, %c0_i32_0 : i32, i32
  }
  func.func @transform_10(%arg0: i32) -> (i32, i32) {
    %c0_i32 = arith.constant 0 : i32
    %c0_i32_0 = arith.constant 0 : i32
    %c0_i32_1 = arith.constant 0 : i32
    return %c0_i32, %c0_i32_0 : i32, i32
  }
  func.func @transform_11(%arg0: i32) -> (i32, i32) {
    %c0_i32 = arith.constant 0 : i32
    %c0_i32_0 = arith.constant 0 : i32
    %c0_i32_1 = arith.constant 0 : i32
    return %c0_i32, %c0_i32_0 : i32, i32
  }
  func.func @transform_12(%arg0: i32) -> (i32, i32) {
    %c0_i32 = arith.constant 0 : i32
    %c0_i32_0 = arith.constant 0 : i32
    %c0_i32_1 = arith.constant 0 : i32
    return %c0_i32, %c0_i32_0 : i32, i32
  }
  func.func @transform_13(%arg0: i32) -> (i32, i32) {
    %c0_i32 = arith.constant 0 : i32
    %c0_i32_0 = arith.constant 0 : i32
    return %arg0, %c0_i32 : i32, i32
  }
}

</mosaic_0001>

<bundles_post_ra>
// kernel: lstm_classifier_forward.1
= control target key start
LH: loop header
LB: loop body
LE: loop exit
PB: predicated region body
PF: predicated region fallthrough
CT: control target
= control target key end

     0   :  { %s3621_s0 = inlined_call_operand.vmem [shape: f32[8,16,16], index: 0, kind: input, shape index: {}]   ;;  %s3622_s1 = inlined_call_operand.vmem [shape: f32[16,128], index: 1, kind: input, shape index: {}]   ;;  %s3623_s2 = inlined_call_operand.vmem [shape: f32[32,128], index: 2, kind: input, shape index: {}]   ;;  %s3624_s3 = inlined_call_operand.vmem [shape: f32[1,128], index: 3, kind: input, shape index: {}]   ;;  %s3625_s4 = inlined_call_operand.vmem [shape: f32[32,128], index: 4, kind: input, shape index: {}]   ;;  %s3626_s5 = inlined_call_operand.vmem [shape: f32[32,128], index: 5, kind: input, shape index: {}]   ;;  %s3627_s6 = inlined_call_operand.vmem [shape: f32[1,128], index: 6, kind: input, shape index: {}]   ;;  %s3628_s7 = inlined_call_operand.vmem [shape: f32[32,32], index: 7, kind: input, shape index: {}]   ;;  %s3629_s8 = inlined_call_operand.vmem [shape: f32[1,32], index: 8, kind: input, shape index: {}]   ;;  %s3630_s9 = inlined_call_operand.vmem [shape: f32[32,16], index: 9, kind: input, shape index: {}]   ;;  %s3631_s10 = inlined_call_operand.vmem [shape: f32[1,16], index: 10, kind: input, shape index: {}]   ;;  %s3632_s11 = inlined_call_operand.vmem [shape: f32[16,1], index: 11, kind: input, shape index: {}]   ;;  %s3633_s12 = inlined_call_operand.<no memory space> [shape: f32[1,1], index: 12, kind: input, shape index: {}]   ;;  %s3634_s13 = inlined_call_operand.vmem [shape: f32[16,1], index: 13, kind: output, shape index: {}]  }
   0x1   :  { %v18_v0 = vstv %s3633_s12 }
   0x2   :  { %19 = vst [vmem:[#allocation4] sm:$0x1] %v18_v0 }
   0x3   :  { %s3090_s27 = smov 0   ;;  %s3092_s28 = smov 0  }
   0x4   :  { %s3094_s29 = smov 0  }
   0x5 LB: > { %s2484_s12 = sadd.s32 4294967295, %s3008_s29   ;;  %s3107_s30 = sadd.s32 1, %s3008_s29   ;;  %s3008_s29 = sphi %s3094_s29, %s3637_s29   ;;  %s3004_s28 = sphi %s3092_s28, %s3636_s28   ;;  %s3000_s27 = sphi %s3090_s27, %s3635_s27  }
   0x6   : > { %s29_s14 = ssub.s32 %s3008_s29, %s3107_s30  ;;  %s32_s15 = sadd.s32 1, %s3004_s28 }
   0x7   : > { %p30_p0 = scmp.eq.s32.totalorder %s29_s14, 0  ;;  %p39_p1 = scmp.ne.s32.totalorder %s3004_s28, %s3000_s27 }
   0x8   : > { %p40_p2 = scmp.eq.s32.totalorder %s3008_s29, 0  ;;  %p2487_p4 = scmp.ge.s32.totalorder %s3008_s29, 2 }
   0x9   : > { %s3116_s16 = scalar_select %p30_p0, %s3004_s28, %s32_s15  }
   0xa   : > { %p41_p3 = por %p40_p2, %p39_p1  ;;  %379 = sbr.rel (%p2487_p4) target bundleno = 25 (0x19), region = 64 }
  0x11   : > { %382 = sbr.rel (!%p41_p3) target bundleno = 25 (0x19), region = 68  ;;  %s384_s17 = sand.u32 (%p41_p3), 1, %s3004_s28  }
  0x12   : > { %s2489_s18 = sshll.u32 (%p41_p3), %s3008_s29, 3  ;;  %s2488_s19 = sshll.u32 (%p41_p3), %s384_s17, 6 }
  0x13   : > { %s388_s22 = scalar_lea.vmem (%p41_p3), %s3621_s0, %s2489_s18  ;;  %s386_s23 = scalar_lea.vmem (%p41_p3), [#allocation5], %s2488_s19 }
  0x14   : > { %v430_v1 = vld [vmem:[%s388_s22] sm:$0xff] (%p41_p3)  ;;  %v432_v2 = vld [vmem:[%s388_s22 + $0x10] sm:$0xff] (%p41_p3) }
  0x15   : > { %v434_v3 = vld [vmem:[%s388_s22 + $0x20] sm:$0xff] (%p41_p3)  ;;  %431 = vst [vmem:[%s386_s23] sm:$0xff] (%p41_p3), %v430_v1  ;;  %433 = vst [vmem:[%s386_s23 + $0x8] sm:$0xff] (%p41_p3), %v432_v2  ;;  %v436_v4 = vld [vmem:[%s388_s22 + $0x30] sm:$0xff] (%p41_p3) }
  0x16   : > { %435 = vst [vmem:[%s386_s23 + $0x10] sm:$0xff] (%p41_p3), %v434_v3  ;;  %v438_v5 = vld [vmem:[%s388_s22 + $0x40] sm:$0xff] (%p41_p3)  ;;  %v440_v6 = vld [vmem:[%s388_s22 + $0x50] sm:$0xff] (%p41_p3)  ;;  %437 = vst [vmem:[%s386_s23 + $0x18] sm:$0xff] (%p41_p3), %v436_v4 }
  0x17   : > { %439 = vst [vmem:[%s386_s23 + $0x20] sm:$0xff] (%p41_p3), %v438_v5  ;;  %441 = vst [vmem:[%s386_s23 + $0x28] sm:$0xff] (%p41_p3), %v440_v6  ;;  %v442_v7 = vld [vmem:[%s388_s22 + $0x60] sm:$0xff] (%p41_p3)  ;;  %v444_v8 = vld [vmem:[%s388_s22 + $0x70] sm:$0xff] (%p41_p3) }
  0x18   : > { %443 = vst [vmem:[%s386_s23 + $0x30] sm:$0xff] %v442_v7  ;;  %445 = vst [vmem:[%s386_s23 + $0x38] sm:$0xff] %v444_v8 }
  0x19 PF: > { %p2490_p5 = scmp.ge.s32.totalorder %s3008_s29, 1  ;;  %p450_p6 = scmp.lt.s32.totalorder %s3008_s29, 3 }
  0x1b   : > { %p451_p7 = pnand %p2490_p5, %p450_p6 }
  0x1c   : > { %v511_v9 = vld [vmem:[%s3622_s1] sm:$0xff] (!%p451_p7)  ;;  %v512_v10 = vld [vmem:[%s3622_s1 + $0x8] sm:$0xff] (!%p451_p7)  ;;  %s457_s15 = sand.u32 (!%p451_p7), 1, %s3000_s27   ;;  %v3010_v11 = vmov (!%p451_p7), 0.0   ;;  %vm3011_vm0 = vmmov (!%p451_p7), 0   ;;  %vm529_vm1 = vcmask (!%p451_p7), 130048   ;;  %v504_v28 = vlaneseq (!%p451_p7) }
  0x1d   : > { %454 = sbr.rel (%p451_p7) target bundleno = 11369 (0x2c69), region = 106  ;;  %2619 = vmatprep.subr.bf16.mxu0 (!%p451_p7), %v3010_v11  ;;  %v3134_v12 = vpack.c.bf16 (!%p451_p7), %v512_v10, %v511_v9  ;;  %2621 = vmatprep.mubr.msk.bf16.mxu0 (!%p451_p7), %vm3011_vm0, %v3010_v11  ;;  %s2491_s17 = sshll.u32 (!%p451_p7), %s457_s15, 6  ;;  %v514_v20 = vld [vmem:[%s3623_s2] sm:$0xff] (!%p451_p7)  ;;  %v515_v21 = vld [vmem:[%s3623_s2 + $0x8] sm:$0xff] (!%p451_p7)  ;;  %v516_v24 = vld [vmem:[%s3623_s2 + $0x10] sm:$0xff] (!%p451_p7)  ;;  %v3012_v27 = vmov (!%p451_p7), 0  }
  0x1e   : > { %2625 = vmatprep.subr.bf16.mxu1 (!%p451_p7), %v3010_v11  ;;  %2627 = vmatprep.mubr.msk.bf16.mxu1 (!%p451_p7), %vm3011_vm0, %v3010_v11  ;;  %s3142_s18 = scalar_lea.vmem (!%p451_p7), [#allocation5], %s2491_s17  ;;  %v3172_v23 = vpack.c.bf16 (!%p451_p7), %v515_v21, %v514_v20  ;;  %v517_v25 = vld [vmem:[%s3623_s2 + $0x18] sm:$0xff] (!%p451_p7)  ;;  %v505_v29 = vand.u32 (!%p451_p7), 127, %v504_v28  ;;  %v3199_v30 = vld [vmem:[%s3624_s3] ss:$0 sm:$0xff] (!%p451_p7)  ;;  %v3013_v31 = vmov (!%p451_p7), 0.5  }
  0x1f   : > { %2620 = vmatpush3.bf16.msra.mxu0 (!%p451_p7), %v3134_v12  ;;  %v521_v13 = vld [vmem:[%s3142_s18] sm:$0xff] (!%p451_p7)  ;;  %2626 = vmatpush3.bf16.msra.mxu1 (!%p451_p7), %v3134_v12  ;;  %v2497_v15 = vld [vmem:[%s3142_s18 + $0x10] sm:$0xff] (!%p451_p7)  ;;  %v3182_v26 = vpack.c.bf16 (!%p451_p7), %v517_v25, %v516_v24  ;;  %s3014_s15 = smov (!%p451_p7), 64   ;;  %s3015_s17 = smov (!%p451_p7), 32   ;;  %v2495_v48 = vld [vmem:[%s3142_s18 + $0x8] sm:$0xff] (!%p451_p7)  ;;  %vm904_vm5 = vcmask (!%p451_p7), 261120  }
  0x20   : > { %v522_v14 = vpack.c.bf16 (!%p451_p7), %v521_v13, %v521_v13  ;;  %2631 = vmatprep.subr.bf16.mxu0 (!%p451_p7), %v3010_v11  ;;  %2637 = vmatprep.subr.bf16.mxu1 (!%p451_p7), %v3010_v11  ;;  %v623_v16 = vpack.c.bf16 (!%p451_p7), %v2497_v15, %v2497_v15  ;;  %v2501_v17 = vld [vmem:[%s3142_s18 + $0x20] sm:$0xff] (!%p451_p7)  ;;  %v2505_v19 = vld [vmem:[%s3142_s18 + $0x30] sm:$0xff] (!%p451_p7)  ;;  %vm506_vm2 = vcmp.ge.s32.totalorder (!%p451_p7), %v505_v29, 64  ;;  %vm507_vm3 = vcmp.lt.s32.totalorder (!%p451_p7), %v505_v29, 96  ;;  %v2499_v50 = vld [vmem:[%s3142_s18 + $0x18] sm:$0xff] (!%p451_p7)  ;;  %p499_p8 = scmp.lt.s32.totalorder (!%p451_p7), %s2484_s12, 1 }
  0x21   : > { %v717_v18 = vpack.c.bf16 (!%p451_p7), %v2501_v17, %v2501_v17  ;;  %v811_v22 = vpack.c.bf16 (!%p451_p7), %v2505_v19, %v2505_v19  ;;  %vm508_vm4 = vmand (!%p451_p7), %vm506_vm2, %vm507_vm3  ;;  %v576_v49 = vpack.c.bf16 (!%p451_p7), %v2495_v48, %v2495_v48  ;;  %v670_v51 = vpack.c.bf16 (!%p451_p7), %v2499_v50, %v2499_v50  ;;  %v2503_v53 = vld [vmem:[%s3142_s18 + $0x28] sm:$0xff] (!%p451_p7)  ;;  %v2507_v55 = vld [vmem:[%s3142_s18 + $0x38] sm:$0xff] (!%p451_p7) }
  0x22   : > { %2622 = vmatmul.mubr.msk.bf16.vlgmr.msra.gmra.mrb[0].mxu0 (!%p451_p7), %vm529_vm1, %v522_v14  ;;  %v3201_v32 = vsel (!%p451_p7), %vm508_vm4, 1.0, %v3013_v31  ;;  %v3205_v40 = vsel (!%p451_p7), %vm508_vm4, 0.0, %v3013_v31  ;;  %v764_v54 = vpack.c.bf16 (!%p451_p7), %v2503_v53, %v2503_v53  ;;  %v858_v56 = vpack.c.bf16 (!%p451_p7), %v2507_v55, %v2507_v55 }
  0x23   : > { %2632 = vmatpush3.bf16.msra.mxu0 (!%p451_p7), %v3134_v12  ;;  %2633 = vmatprep.mubr.msk.bf16.mxu0 (!%p451_p7), %vm3011_vm0, %v3010_v11  ;;  %vm2423_vm6 = vcmask (!%p451_p7), 7168  }
  0x24   : > { %2643 = vmatprep.subr.bf16.mxu0 %v3010_v11  ;;  %2628 = vmatmul.mubr.msk.bf16.vlgmr.msra.gmra.mrb[0].mxu1 %vm529_vm1, %v576_v49  ;;  %s3639_s12 = smov (!%p499_p8, %s2484_s12), 1 }
  0x25   : > { %2638 = vmatpush3.bf16.msra.mxu1 %v3134_v12  ;;  %2639 = vmatprep.mubr.msk.bf16.mxu1 %vm3011_vm0, %v3010_v11  ;;  %s2492_s24 = sshll.u32 %s3639_s12, 3 }
  0x26   : > { %2649 = vmatprep.subr.bf16.mxu1 %v3010_v11  ;;  %s502_s26 = scalar_lea.vmem %s3634_s13, %s2492_s24 }
  0x2a   : > { %2634 = vmatmul.mubr.msk.bf16.vlgmr.msra.gmra.mrb[4].mxu0 %vm529_vm1, %v623_v16 }
  0x2b   : > { %2644 = vmatpush3.bf16.msra.mxu0 %v3134_v12  ;;  %2645 = vmatprep.mubr.msk.bf16.mxu0 %vm3011_vm0, %v3010_v11 }
  0x2c   : > { %2655 = vmatprep.subr.bf16.mxu0 %v3010_v11  ;;  %2640 = vmatmul.mubr.msk.bf16.vlgmr.msra.gmra.mrb[4].mxu1 %vm529_vm1, %v670_v51 }
  0x2d   : > { %2650 = vmatpush3.bf16.msra.mxu1 %v3134_v12  ;;  %2651 = vmatprep.mubr.msk.bf16.mxu1 %vm3011_vm0, %v3010_v11 }
  0x2e   : > { %2661 = vmatprep.subr.bf16.mxu1 %v3010_v11 }
  0x32   : > { %2646 = vmatmul.mubr.msk.bf16.vlgmr.msra.gmra.mrb[8].mxu0 %vm529_vm1, %v717_v18 }
  0x33   : > { %2656 = vmatpush3.bf16.msra.mxu0 %v3134_v12  ;;  %2657 = vmatprep.mubr.msk.bf16.mxu0 %vm3011_vm0, %v3010_v11 }
  0x34   : > { %2667 = vmatprep.subr.bf16.mxu0 %v3010_v11  ;;  %2652 = vmatmul.mubr.msk.bf16.vlgmr.msra.gmra.mrb[8].mxu1 %vm529_vm1, %v764_v54 }
  0x35   : > { %2662 = vmatpush3.bf16.msra.mxu1 %v3134_v12  ;;  %2663 = vmatprep.mubr.msk.bf16.mxu1 %vm3011_vm0, %v3010_v11 }
  0x36   : > { %2675 = vmatprep.subr.bf16.mxu1 %v3010_v11 }
  0x3a   : > { %2658 = vmatmul.mubr.msk.bf16.vlgmr.msra.gmra.mrb[12].mxu0 %vm529_vm1, %v811_v22 }
  0x3b   : > { %2668 = vmatpush3.bf16.msra.mxu0 %v3172_v23  ;;  %2671 = vmatprep.mubr.msk.bf16.mxu0 %vm3011_vm0, %v3010_v11 }
  0x3c   : > { %2669 = vmatprep.subr.bf16.mxu0 %v3010_v11  ;;  %2664 = vmatmul.mubr.msk.bf16.vlgmr.msra.gmra.mrb[12].mxu1 %vm529_vm1, %v858_v56 }
  0x3d   : > { %2676 = vmatpush3.bf16.msra.mxu1 %v3172_v23  ;;  %2679 = vmatprep.mubr.msk.bf16.mxu1 %vm3011_vm0, %v3010_v11 }
  0x3e   : > { %2677 = vmatprep.subr.bf16.mxu1 %v3010_v11 }
  0x3f   : > { %2670 = vmatpush3.bf16.msra.mxu0 %v3182_v26 }
  0x40   : > { %2683 = vmatprep.subr.bf16.mxu0 %v3010_v11 }
  0x41   : > { %2678 = vmatpush3.bf16.msra.mxu1 %v3182_v26 }
  0x42   : > { %2672 = vmatmul.mubr.bf16.vlgmr.msra.gmra.mrb[0].mxu0 %v3012_v27  ;;  %2691 = vmatprep.subr.bf16.mxu1 %v3010_v11 }
  0x43   : > { %2684 = vmatpush3.bf16.msra.mxu0 %v3172_v23  ;;  %2687 = vmatprep.mubr.msk.bf16.mxu0 %vm3011_vm0, %v3010_v11 }
  0x44   : > { %2685 = vmatprep.subr.bf16.mxu0 %v3010_v11 }
  0x47   : > { %2686 = vmatpush3.bf16.msra.mxu0 %v3182_v26 }
  0x48   : > { %2699 = vmatprep.subr.bf16.mxu0 %v3010_v11 }
 0x115   : > { %v942_v33 = vpop.f32.mrb[0].mxu0 }
 0x116   : > { %v2851_v34 = vadd.f32 %v3199_v30, %v942_v33  ;;  %v2673_v35 = vpop.f32.mrb[1].mxu0 }
 0x117   : > { %v945_v36 = vpop.f32.mrb[2].mxu0 }
 0x118   : > { %v949_v37 = vmul.f32 %v2851_v34, %v3201_v32  ;;  %v2674_v38 = vpop.f32.mrb[3].mxu0 }
 0x11a   : > { %2922 = vtanh.f32 %v949_v37 }
 0x124   : > { %v2923_v39 = vpop.eup %2922 }
 0x125   : > { %v951_v41 = vmul.f32 %v2923_v39, %v3201_v32 }
 0x127   : > { %v952_v42 = vadd.f32 %v951_v41, %v3205_v40 }
 0x129   : > { %955 = vrot.lane.b32.xlu0 %v952_v42, %s3014_s15  ;;  %v953_v45 = vmul.f32 0.0, %v952_v42 }
 0x19b   : > { %v956_v43 = vpop.permute.xlu0 %955 }
 0x19c   : > { %v958_v44 = vmul.f32 %v956_v43, %v952_v42 }
 0x19e   : > { %960 = vrot.lane.b32.xlu0 %v958_v44, %s3015_s17 }
 0x210   : > { %v961_v46 = vpop.permute.xlu0 %960 }
 0x211   : > { %v963_v47 = vadd.f32 %v961_v46, %v953_v45 }
 0x213   : > { %2924 = vtanh.f32 %v963_v47 }
 0x21d   : > { %v2925_v52 = vpop.eup %2924 }
 0x21e   : > { %966 = vrot.lane.b32.xlu1 %v2925_v52, %s3014_s15 }
 0x290   : > { %v967_v57 = vpop.permute.xlu1 %966 }
 0x291   : > { %v3238_v58 = vmul.f32 %v967_v57, %v952_v42 }
 0x293   : > { %v976_v59 = vpack.c.bf16 %v3238_v58, %v3238_v58 }
 0x295   : > { %978 = vrot.lane.b32.xlu1 %v976_v59, %s3015_s17 }
 0x307   : > { %v979_v60 = vpop.permute.xlu1 %978 }
 0x308   : > { %2680 = vmatmul.mubr.msk.bf16.vlgmr.msra.gmra.mrb[0].mxu1 %vm904_vm5, %v979_v60 }
 0x309   : > { %2692 = vmatpush3.bf16.msra.mxu1 %v3172_v23  ;;  %2695 = vmatprep.mubr.msk.bf16.mxu1 %vm3011_vm0, %v3010_v11 }
 0x30a   : > { %2693 = vmatprep.subr.bf16.mxu1 %v3010_v11 }
 0x30d   : > { %2694 = vmatpush3.bf16.msra.mxu1 %v3182_v26 }
 0x30e   : > { %2707 = vmatprep.subr.bf16.mxu1 %v3010_v11 }
 0x3db   : > { %v1017_v61 = vpop.f32.mrb[0].mxu1 }
 0x3dc   : > { %v2852_v62 = vadd.f32 %v3199_v30, %v1017_v61  ;;  %v2681_v63 = vpop.f32.mrb[1].mxu1 }
 0x3dd   : > { %v1020_v0 = vpop.f32.mrb[2].mxu1 }
 0x3de   : > { %v1024_v1 = vmul.f32 %v2852_v62, %v3201_v32  ;;  %v2682_v2 = vpop.f32.mrb[3].mxu1 }
 0x3e0   : > { %2926 = vtanh.f32 %v1024_v1 }
 0x3ea   : > { %v2927_v3 = vpop.eup %2926 }
 0x3eb   : > { %v1026_v4 = vmul.f32 %v2927_v3, %v3201_v32 }
 0x3ed   : > { %v1027_v5 = vadd.f32 %v1026_v4, %v3205_v40 }
 0x3ef   : > { %1030 = vrot.lane.b32.xlu0 %v1027_v5, %s3014_s15  ;;  %v1028_v8 = vmul.f32 %v1027_v5, %v963_v47 }
 0x461   : > { %v1031_v6 = vpop.permute.xlu0 %1030 }
 0x462   : > { %v1033_v7 = vmul.f32 %v1031_v6, %v1027_v5 }
 0x464   : > { %1035 = vrot.lane.b32.xlu1 %v1033_v7, %s3015_s17 }
 0x4d6   : > { %v1036_v9 = vpop.permute.xlu1 %1035 }
 0x4d7   : > { %v1038_v10 = vadd.f32 %v1036_v9, %v1028_v8 }
 0x4d9   : > { %2928 = vtanh.f32 %v1038_v10 }
 0x4e3   : > { %v2929_v12 = vpop.eup %2928 }
 0x4e4   : > { %1041 = vrot.lane.b32.xlu0 %v2929_v12, %s3014_s15 }
 0x556   : > { %v1042_v13 = vpop.permute.xlu0 %1041 }
 0x557   : > { %v3257_v14 = vmul.f32 %v1042_v13, %v1027_v5 }
 0x559   : > { %v1051_v15 = vpack.c.bf16 %v3257_v14, %v3257_v14 }
 0x55b   : > { %1053 = vrot.lane.b32.xlu1 %v1051_v15, %s3015_s17 }
 0x5cd   : > { %v1054_v16 = vpop.permute.xlu1 %1053 }
 0x5ce   : > { %2688 = vmatmul.mubr.msk.bf16.vlgmr.msra.gmra.mrb[4].mxu0 %vm904_vm5, %v1054_v16 }
 0x5cf   : > { %2700 = vmatpush3.bf16.msra.mxu0 %v3172_v23  ;;  %2703 = vmatprep.mubr.msk.bf16.mxu0 %vm3011_vm0, %v3010_v11 }
 0x5d0   : > { %2701 = vmatprep.subr.bf16.mxu0 %v3010_v11 }
 0x5d3   : > { %2702 = vmatpush3.bf16.msra.mxu0 %v3182_v26 }
 0x5d4   : > { %2715 = vmatprep.subr.bf16.mxu0 %v3010_v11 }
 0x6a1   : > { %v1092_v17 = vpop.f32.mrb[4].mxu0 }
 0x6a2   : > { %v2853_v18 = vadd.f32 %v3199_v30, %v1092_v17  ;;  %v2689_v19 = vpop.f32.mrb[5].mxu0 }
 0x6a3   : > { %v1095_v20 = vpop.f32.mrb[6].mxu0 }
 0x6a4   : > { %v1099_v21 = vmul.f32 %v2853_v18, %v3201_v32  ;;  %v2690_v22 = vpop.f32.mrb[7].mxu0 }
 0x6a6   : > { %2930 = vtanh.f32 %v1099_v21 }
 0x6b0   : > { %v2931_v24 = vpop.eup %2930 }
 0x6b1   : > { %v1101_v25 = vmul.f32 %v2931_v24, %v3201_v32 }
 0x6b3   : > { %v1102_v28 = vadd.f32 %v1101_v25, %v3205_v40 }
 0x6b5   : > { %1105 = vrot.lane.b32.xlu0 %v1102_v28, %s3014_s15  ;;  %v1103_v33 = vmul.f32 %v1102_v28, %v1038_v10 }
 0x727   : > { %v1106_v29 = vpop.permute.xlu0 %1105 }
 0x728   : > { %v1108_v31 = vmul.f32 %v1106_v29, %v1102_v28 }
 0x72a   : > { %1110 = vrot.lane.b32.xlu1 %v1108_v31, %s3015_s17 }
 0x79c   : > { %v1111_v34 = vpop.permute.xlu1 %1110 }
 0x79d   : > { %v1113_v35 = vadd.f32 %v1111_v34, %v1103_v33 }
 0x79f   : > { %2932 = vtanh.f32 %v1113_v35 }
 0x7a9   : > { %v2933_v36 = vpop.eup %2932 }
 0x7aa   : > { %1116 = vrot.lane.b32.xlu0 %v2933_v36, %s3014_s15 }
 0x81c   : > { %v1117_v37 = vpop.permute.xlu0 %1116 }
 0x81d   : > { %v3276_v38 = vmul.f32 %v1117_v37, %v1102_v28 }
 0x81f   : > { %v1126_v39 = vpack.c.bf16 %v3276_v38, %v3276_v38 }
 0x821   : > { %1128 = vrot.lane.b32.xlu1 %v1126_v39, %s3015_s17 }
 0x893   : > { %v1129_v41 = vpop.permute.xlu1 %1128 }
 0x894   : > { %2696 = vmatmul.mubr.msk.bf16.vlgmr.msra.gmra.mrb[4].mxu1 %vm904_vm5, %v1129_v41 }
 0x895   : > { %2708 = vmatpush3.bf16.msra.mxu1 %v3172_v23  ;;  %2711 = vmatprep.mubr.msk.bf16.mxu1 %vm3011_vm0, %v3010_v11 }
 0x896   : > { %2709 = vmatprep.subr.bf16.mxu1 %v3010_v11 }
 0x899   : > { %2710 = vmatpush3.bf16.msra.mxu1 %v3182_v26 }
 0x89a   : > { %2723 = vmatprep.subr.bf16.mxu1 %v3010_v11 }
 0x967   : > { %v1167_v42 = vpop.f32.mrb[4].mxu1 }
 0x968   : > { %v2854_v43 = vadd.f32 %v3199_v30, %v1167_v42  ;;  %v2697_v44 = vpop.f32.mrb[5].mxu1 }
 0x969   : > { %v1170_v45 = vpop.f32.mrb[6].mxu1 }
 0x96a   : > { %v1174_v46 = vmul.f32 %v2854_v43, %v3201_v32  ;;  %v2698_v47 = vpop.f32.mrb[7].mxu1 }
 0x96c   : > { %2934 = vtanh.f32 %v1174_v46 }
 0x976   : > { %v2935_v48 = vpop.eup %2934 }
 0x977   : > { %v1176_v49 = vmul.f32 %v2935_v48, %v3201_v32 }
 0x979   : > { %v1177_v50 = vadd.f32 %v1176_v49, %v3205_v40 }
 0x97b   : > { %1180 = vrot.lane.b32.xlu0 %v1177_v50, %s3014_s15  ;;  %v1178_v53 = vmul.f32 %v1177_v50, %v1113_v35 }
 0x9ed   : > { %v1181_v51 = vpop.permute.xlu0 %1180 }
 0x9ee   : > { %v1183_v52 = vmul.f32 %v1181_v51, %v1177_v50 }
 0x9f0   : > { %1185 = vrot.lane.b32.xlu1 %v1183_v52, %s3015_s17 }
 0xa62   : > { %v1186_v54 = vpop.permute.xlu1 %1185 }
 0xa63   : > { %v1188_v55 = vadd.f32 %v1186_v54, %v1178_v53 }
 0xa65   : > { %2936 = vtanh.f32 %v1188_v55 }
 0xa6f   : > { %v2937_v56 = vpop.eup %2936 }
 0xa70   : > { %1191 = vrot.lane.b32.xlu0 %v2937_v56, %s3014_s15 }
 0xae2   : > { %v1192_v57 = vpop.permute.xlu0 %1191 }
 0xae3   : > { %v3295_v59 = vmul.f32 %v1192_v57, %v1177_v50 }
 0xae5   : > { %v1201_v60 = vpack.c.bf16 %v3295_v59, %v3295_v59 }
 0xae7   : > { %1203 = vrot.lane.b32.xlu1 %v1201_v60, %s3015_s17 }
 0xb59   : > { %v1204_v61 = vpop.permute.xlu1 %1203 }
 0xb5a   : > { %2704 = vmatmul.mubr.msk.bf16.vlgmr.msra.gmra.mrb[8].mxu0 %vm904_vm5, %v1204_v61  ;;  %v1500_v61 = vld [vmem:[%s3625_s4] sm:$0xff] }
 0xb5b   : > { %2716 = vmatpush3.bf16.msra.mxu0 %v3172_v23  ;;  %2719 = vmatprep.mubr.msk.bf16.mxu0 %vm3011_vm0, %v3010_v11 }
 0xb5c   : > { %2717 = vmatprep.subr.bf16.mxu0 %v3010_v11 }
 0xb5f   : > { %2718 = vmatpush3.bf16.msra.mxu0 %v3182_v26 }
 0xc2d   : > { %v1242_v62 = vpop.f32.mrb[8].mxu0 }
 0xc2e   : > { %v2855_v63 = vadd.f32 %v3199_v30, %v1242_v62  ;;  %v2705_v0 = vpop.f32.mrb[9].mxu0  ;;  %v1502_v62 = vld [vmem:[%s3625_s4 + $0x10] sm:$0xff] }
 0xc2f   : > { %v1245_v1 = vpop.f32.mrb[10].mxu0 }
 0xc30   : > { %v1249_v2 = vmul.f32 %v2855_v63, %v3201_v32  ;;  %v2706_v3 = vpop.f32.mrb[11].mxu0  ;;  %v1503_v63 = vld [vmem:[%s3625_s4 + $0x18] sm:$0xff] }
 0xc31   : > { %v1505_v0 = vpack.c.bf16 %v1503_v63, %v1502_v62 }
 0xc32   : > { %2938 = vtanh.f32 %v1249_v2 }
 0xc3c   : > { %v2939_v4 = vpop.eup %2938 }
 0xc3d   : > { %v1251_v5 = vmul.f32 %v2939_v4, %v3201_v32 }
 0xc3f   : > { %v1252_v6 = vadd.f32 %v1251_v5, %v3205_v40 }
 0xc41   : > { %1255 = vrot.lane.b32.xlu0 %v1252_v6, %s3014_s15  ;;  %v1253_v9 = vmul.f32 %v1252_v6, %v1188_v55 }
 0xcb3   : > { %v1256_v7 = vpop.permute.xlu0 %1255 }
 0xcb4   : > { %v1258_v8 = vmul.f32 %v1256_v7, %v1252_v6 }
 0xcb6   : > { %1260 = vrot.lane.b32.xlu1 %v1258_v8, %s3015_s17 }
 0xd28   : > { %v1261_v10 = vpop.permute.xlu1 %1260 }
 0xd29   : > { %v1263_v12 = vadd.f32 %v1261_v10, %v1253_v9  ;;  %v1507_v9 = vld [vmem:[%s3626_s5 + $0x8] sm:$0xff] }
 0xd2b   : > { %2940 = vtanh.f32 %v1263_v12 }
 0xd35   : > { %v2941_v13 = vpop.eup %2940 }
 0xd36   : > { %1266 = vrot.lane.b32.xlu0 %v2941_v13, %s3014_s15 }
 0xda8   : > { %v1267_v15 = vpop.permute.xlu0 %1266 }
 0xda9   : > { %v3313_v16 = vmul.f32 %v1267_v15, %v1252_v6 }
 0xdab   : > { %v1276_v17 = vpack.c.bf16 %v3313_v16, %v3313_v16 }
 0xdad   : > { %1278 = vrot.lane.b32.xlu1 %v1276_v17, %s3015_s17  ;;  %v1508_v17 = vld [vmem:[%s3626_s5 + $0x10] sm:$0xff] }
 0xe1f   : > { %v1279_v18 = vpop.permute.xlu1 %1278 }
 0xe20   : > { %2712 = vmatmul.mubr.msk.bf16.vlgmr.msra.gmra.mrb[8].mxu1 %vm904_vm5, %v1279_v18  ;;  %v1509_v18 = vld [vmem:[%s3626_s5 + $0x18] sm:$0xff] }
 0xe21   : > { %2724 = vmatpush3.bf16.msra.mxu1 %v3172_v23  ;;  %2727 = vmatprep.mubr.msk.bf16.mxu1 %vm3011_vm0, %v3010_v11 }
 0xe22   : > { %2725 = vmatprep.subr.bf16.mxu1 %v3010_v11 }
 0xe25   : > { %2726 = vmatpush3.bf16.msra.mxu1 %v3182_v26 }
 0xe26   : > { %2743 = vmatprep.subr.bf16.mxu1 %v3010_v11 }
 0xef3   : > { %v1317_v19 = vpop.f32.mrb[8].mxu1 }
 0xef4   : > { %v2856_v20 = vadd.f32 %v3199_v30, %v1317_v19  ;;  %v2713_v21 = vpop.f32.mrb[9].mxu1  ;;  %v3396_v19 = vpack.c.bf16 %v1509_v18, %v1508_v17 }
 0xef5   : > { %v1320_v22 = vpop.f32.mrb[10].mxu1 }
 0xef6   : > { %v1324_v24 = vmul.f32 %v2856_v20, %v3201_v32  ;;  %v2714_v25 = vpop.f32.mrb[11].mxu1 }
 0xef8   : > { %2942 = vtanh.f32 %v1324_v24 }
 0xf02   : > { %v2943_v28 = vpop.eup %2942 }
 0xf03   : > { %v1326_v23 = vmul.f32 %v2943_v28, %v3201_v32 }
 0xf05   : > { %v1327_v29 = vadd.f32 %v1326_v23, %v3205_v40 }
 0xf07   : > { %1330 = vrot.lane.b32.xlu0 %v1327_v29, %s3014_s15  ;;  %v1328_v33 = vmul.f32 %v1327_v29, %v1263_v12 }
 0xf79   : > { %v1331_v31 = vpop.permute.xlu0 %1330 }
 0xf7a   : > { %v1333_v26 = vmul.f32 %v1331_v31, %v1327_v29  ;;  %v3421_v31 = vld [vmem:[%s3627_s6] ss:$0 sm:$0xff] }
 0xf7c   : > { %1335 = vrot.lane.b32.xlu1 %v1333_v26, %s3015_s17 }
 0xfee   : > { %v1336_v34 = vpop.permute.xlu1 %1335 }
 0xfef   : > { %v1338_v35 = vadd.f32 %v1336_v34, %v1328_v33 }
 0xff1   : > { %2944 = vtanh.f32 %v1338_v35 }
 0xffb   : > { %v2945_v36 = vpop.eup %2944 }
 0xffc   : > { %1341 = vrot.lane.b32.xlu0 %v2945_v36, %s3014_s15 }
0x106e   : > { %v1342_v37 = vpop.permute.xlu0 %1341 }
0x106f   : > { %v3332_v39 = vmul.f32 %v1342_v37, %v1327_v29 }
0x1071   : > { %v1351_v41 = vpack.c.bf16 %v3332_v39, %v3332_v39 }
0x1073   : > { %1353 = vrot.lane.b32.xlu1 %v1351_v41, %s3015_s17 }
0x10e5   : > { %v1354_v42 = vpop.permute.xlu1 %1353 }
0x10e6   : > { %2720 = vmatmul.mubr.msk.bf16.vlgmr.msra.gmra.mrb[12].mxu0 %vm904_vm5, %v1354_v42 }
0x11b9   : > { %v1392_v43 = vpop.f32.mrb[12].mxu0 }
0x11ba   : > { %v2857_v44 = vadd.f32 %v3199_v30, %v1392_v43  ;;  %v2721_v45 = vpop.f32.mrb[13].mxu0 }
0x11bb   : > { %v1395_v46 = vpop.f32.mrb[14].mxu0 }
0x11bc   : > { %v1399_v47 = vmul.f32 %v2857_v44, %v3201_v32  ;;  %v2722_v48 = vpop.f32.mrb[15].mxu0 }
0x11be   : > { %2946 = vtanh.f32 %v1399_v47 }
0x11c8   : > { %v2947_v49 = vpop.eup %2946 }
0x11c9   : > { %v1401_v50 = vmul.f32 %v2947_v49, %v3201_v32 }
0x11cb   : > { %v1402_v51 = vadd.f32 %v1401_v50, %v3205_v40 }
0x11cd   : > { %1405 = vrot.lane.b32.xlu0 %v1402_v51, %s3014_s15  ;;  %v1403_v54 = vmul.f32 %v1402_v51, %v1338_v35 }
0x123f   : > { %v1406_v52 = vpop.permute.xlu0 %1405 }
0x1240   : > { %v1408_v53 = vmul.f32 %v1406_v52, %v1402_v51 }
0x1242   : > { %1410 = vrot.lane.b32.xlu1 %v1408_v53, %s3015_s17 }
0x1246   : > { %971 = vrot.lane.b32.xlu1 %v3238_v58, %s3015_s17  ;;  %v1501_v58 = vld [vmem:[%s3625_s4 + $0x8] sm:$0xff] }
0x124a   : > { %1121 = vrot.lane.b32.xlu1 %v3276_v38, %s3015_s17  ;;  %v1504_v38 = vpack.c.bf16 %v1501_v58, %v1500_v61 }
0x124c   : > { %2731 = vmatprep.subr.bf16.mxu0 %v1504_v38 }
0x124d   : > { %2732 = vmatpush3.bf16.msra.mxu0 %v1504_v38 }
0x124e   : > { %2733 = vmatprep.subr.bf16.mxu0 %v1505_v0 }
0x1251   : > { %2734 = vmatpush3.bf16.msra.mxu0 %v1505_v0 }
0x1252   : > { %2759 = vmatprep.subr.bf16.mxu0 %v3010_v11 }
0x12b4   : > { %v1411_v55 = vpop.permute.xlu1 %1410 }
0x12b5   : > { %v3348_v56 = vadd.f32 %v1411_v55, %v1403_v54 }
0x12b7   : > { %2948 = vtanh.f32 %v3348_v56 }
0x12b8   : > { %v972_v57 = vpop.permute.xlu1 %971 }
0x12b9   : > { %974 = vst.msk [vmem:[#allocation3] sm:$0xff] %vm904_vm5, %v972_v57 }
0x12bc   : > { %v1122_v60 = vpop.permute.xlu1 %1121 }
0x12bd   : > { %1124 = vst.msk [vmem:[#allocation3 + $0x10] sm:$0xff] %vm904_vm5, %v1122_v60 }
0x12c0   : > { %v1513_v7 = vld [vmem:[#allocation3] sm:$0xff] }
0x12c1   : > { %v2949_v1 = vpop.eup %2948 }
0x12c2   : > { %1416 = vrot.lane.b32.xlu0 %v2949_v1, %s3014_s15 }
0x12c4   : > { %v1515_v10 = vld [vmem:[#allocation3 + $0x10] sm:$0xff] }
0x12c6   : > { %1046 = vrot.lane.b32.xlu0 %v3257_v14, %s3015_s17 }
0x12ca   : > { %1196 = vrot.lane.b32.xlu0 %v3295_v59, %s3015_s17  ;;  %v1506_v59 = vld [vmem:[%s3626_s5] sm:$0xff] }
0x12cb   : > { %v3385_v15 = vpack.c.bf16 %v1507_v9, %v1506_v59 }
0x1334   : > { %v1417_v2 = vpop.permute.xlu0 %1416 }
0x1335   : > { %v3371_v3 = vmul.f32 %v1417_v2, %v1402_v51 }
0x1337   : > { %v1426_v4 = vpack.c.bf16 %v3371_v3, %v3371_v3 }
0x1338   : > { %v1047_v5 = vpop.permute.xlu0 %1046 }
0x1339   : > { %1049 = vst.msk [vmem:[#allocation3 + $0x8] sm:$0xff] %vm904_vm5, %v1047_v5  ;;  %1428 = vrot.lane.b32.xlu1 %v1426_v4, %s3015_s17 }
0x133c   : > { %v1197_v6 = vpop.permute.xlu0 %1196 }
0x133d   : > { %1199 = vst.msk [vmem:[#allocation3 + $0x18] sm:$0xff] %vm904_vm5, %v1197_v6 }
0x1340   : > { %v1514_v8 = vld [vmem:[#allocation3 + $0x8] sm:$0xff] }
0x1341   : > { %v1521_v14 = vpack.c.bf16 %v1514_v8, %v1513_v7 }
0x1343   : > { %2735 = vmatprep.mubr.msk.bf16.mxu0 %vm904_vm5, %v1521_v14 }
0x1344   : > { %v1516_v12 = vld [vmem:[#allocation3 + $0x18] sm:$0xff] }
0x1345   : > { %v1522_v13 = vpack.c.bf16 %v1516_v12, %v1515_v10 }
0x1347   : > { %2736 = vmatmul.mubr.msk.bf16.vlgmr.msra.gmra.mrb[16].mxu0 %vm904_vm5, %v1522_v13 }
0x1348   : > { %2760 = vmatpush3.bf16.msra.mxu0 %v3385_v15 }
0x1349   : > { %2761 = vmatprep.subr.bf16.mxu0 %v3010_v11 }
0x134c   : > { %2762 = vmatpush3.bf16.msra.mxu0 %v3396_v19 }
0x134d   : > { %2775 = vmatprep.subr.bf16.mxu0 %v3010_v11 }
0x13ab   : > { %v1429_v20 = vpop.permute.xlu1 %1428 }
0x13ac   : > { %2728 = vmatmul.mubr.msk.bf16.vlgmr.msra.gmra.mrb[12].mxu1 %vm904_vm5, %v1429_v20 }
0x13ad   : > { %2744 = vmatpush3.bf16.msra.mxu1 %v3385_v15  ;;  %2747 = vmatprep.mubr.msk.bf16.mxu1 %vm3011_vm0, %v3010_v11 }
0x13ae   : > { %2745 = vmatprep.subr.bf16.mxu1 %v3010_v11 }
0x13b1   : > { %2746 = vmatpush3.bf16.msra.mxu1 %v3396_v19 }
0x13b2   : > { %2751 = vmatprep.subr.bf16.mxu1 %v3010_v11 }
0x13b4   : > { %2748 = vmatmul.mubr.bf16.vlgmr.msra.gmra.mrb[16].mxu1 %v3012_v27 }
0x13b5   : > { %2752 = vmatpush3.bf16.msra.mxu1 %v3385_v15  ;;  %2755 = vmatprep.mubr.msk.bf16.mxu1 %vm3011_vm0, %v3010_v11 }
0x13b6   : > { %2753 = vmatprep.subr.bf16.mxu1 %v3010_v11 }
0x13b9   : > { %2754 = vmatpush3.bf16.msra.mxu1 %v3396_v19 }
0x13ba   : > { %2767 = vmatprep.subr.bf16.mxu1 %v3010_v11 }
0x141a   : > { %v3414_v21 = vpop.f32.mrb[16].mxu0 }
0x141b   : > { %v1577_v22 = vpop.f32.mrb[17].mxu0 }
0x141c   : > { %v3416_v24 = vpop.f32.mrb[18].mxu0  ;;  %v1578_v26 = vadd.f32 %v3421_v31, %v1577_v22 }
0x141d   : > { %v1580_v25 = vpop.f32.mrb[19].mxu0 }
0x141e   : > { %v1581_v5 = vadd.f32 %v3421_v31, %v1580_v25 }
0x147f   : > { %v1467_v28 = vpop.f32.mrb[12].mxu1 }
0x1480   : > { %v2729_v23 = vpop.f32.mrb[13].mxu1  ;;  %v2858_v47 = vadd.f32 %v3199_v30, %v1467_v28 }
0x1481   : > { %v1470_v27 = vpop.f32.mrb[14].mxu1 }
0x1482   : > { %v2730_v29 = vpop.f32.mrb[15].mxu1  ;;  %v1474_v48 = vmul.f32 %v2858_v47, %v3201_v32 }
0x1487   : > { %v1651_v33 = vpop.f32.mrb[16].mxu1 }
0x1488   : > { %v1657_v34 = vadd.f32 %v1651_v33, %v1578_v26  ;;  %v2749_v35 = vpop.f32.mrb[17].mxu1 }
0x1489   : > { %v1654_v36 = vpop.f32.mrb[18].mxu1 }
0x148a   : > { %v1658_v37 = vmul.f32 %v1657_v34, %v3201_v32  ;;  %v2750_v41 = vpop.f32.mrb[19].mxu1 }
0x148c   : > { %2950 = vtanh.f32 %v1658_v37 }
0x148d   : > { %2952 = vtanh.f32 %v1474_v48 }
0x1496   : > { %v2951_v42 = vpop.eup %2950 }
0x1497   : > { %v1660_v43 = vmul.f32 %v2951_v42, %v3201_v32  ;;  %v2953_v52 = vpop.eup %2952 }
0x1498   : > { %v1476_v53 = vmul.f32 %v2953_v52, %v3201_v32 }
0x1499   : > { %v1661_v44 = vadd.f32 %v1660_v43, %v3205_v40 }
0x149a   : > { %v1477_v55 = vadd.f32 %v1476_v53, %v3205_v40 }
0x149b   : > { %1664 = vrot.lane.b32.xlu0 %v1661_v44, %s3014_s15  ;;  %v1662_v49 = vmul.f32 0.0, %v1661_v44 }
0x149c   : > { %v1478_v62 = vmul.f32 %v1477_v55, %v3348_v56 }
0x150d   : > { %v1665_v45 = vpop.permute.xlu0 %1664 }
0x150e   : > { %v1667_v46 = vmul.f32 %v1665_v45, %v1661_v44 }
0x1510   : > { %1669 = vrot.lane.b32.xlu1 %v1667_v46, %s3015_s17  ;;  %v1586_v46 = vadd.f32 %v3414_v21, %v3421_v31 }
0x1582   : > { %v1670_v50 = vpop.permute.xlu1 %1669 }
0x1583   : > { %v1672_v51 = vadd.f32 %v1670_v50, %v1662_v49 }
0x1585   : > { %2954 = vtanh.f32 %v1672_v51 }
0x158f   : > { %v2955_v54 = vpop.eup %2954 }
0x1590   : > { %1675 = vrot.lane.b32.xlu0 %v2955_v54, %s3014_s15 }
0x1594   : > { %1480 = vrot.lane.b32.xlu0 %v1477_v55, %s3014_s15 }
0x1602   : > { %v1676_v57 = vpop.permute.xlu0 %1675 }
0x1603   : > { %v1678_v60 = vmul.f32 %v1676_v57, %v1661_v44 }
0x1605   : > { %v1680_v30 = vpack.c.bf16 %v1678_v60, %v1678_v60 }
0x1606   : > { %v1481_v61 = vpop.permute.xlu0 %1480 }
0x1607   : > { %v1483_v58 = vmul.f32 %v1481_v61, %v1477_v55  ;;  %1682 = vrot.lane.b32.xlu1 %v1680_v30, %s3015_s17 }
0x1609   : > { %1485 = vrot.lane.b32.xlu0 %v1483_v58, %s3015_s17 }
0x1679   : > { %v1683_v38 = vpop.permute.xlu1 %1682 }
0x167a   : > { %2756 = vmatmul.mubr.msk.bf16.vlgmr.msra.gmra.mrb[20].mxu1 %vm904_vm5, %v1683_v38 }
0x167b   : > { %v1486_v63 = vpop.permute.xlu0 %1485  ;;  %2768 = vmatpush3.bf16.msra.mxu1 %v3385_v15  ;;  %2771 = vmatprep.mubr.msk.bf16.mxu1 %vm3011_vm0, %v3010_v11 }
0x167c   : > { %v1488_v0 = vadd.f32 %v1486_v63, %v1478_v62  ;;  %2769 = vmatprep.subr.bf16.mxu1 %v3010_v11 }
0x167e   : > { %2956 = vtanh.f32 %v1488_v0 }
0x167f   : > { %2770 = vmatpush3.bf16.msra.mxu1 %v3396_v19 }
0x1680   : > { %2783 = vmatprep.subr.bf16.mxu1 %v3010_v11 }
0x1688   : > { %v2957_v1 = vpop.eup %2956 }
0x1689   : > { %1491 = vrot.lane.b32.xlu0 %v2957_v1, %s3014_s15  ;;  %v1589_v1 = vadd.f32 %v3416_v24, %v3421_v31 }
0x168d   : > { %1271 = vrot.lane.b32.xlu0 %v3313_v16, %s3015_s17 }
0x1691   : > { %1421 = vrot.lane.b32.xlu0 %v3371_v3, %s3015_s17 }
0x16fb   : > { %v1492_v56 = vpop.permute.xlu0 %1491 }
0x16fc   : > { %v1494_v25 = vmul.f32 %v1492_v56, %v1477_v55 }
0x16ff   : > { %v1272_v2 = vpop.permute.xlu0 %1271 }
0x1700   : > { %1274 = vst.msk [vmem:[#allocation3 + $0x20] sm:$0xff] %vm904_vm5, %v1272_v2 }
0x1703   : > { %v1422_v4 = vpop.permute.xlu0 %1421 }
0x1704   : > { %1424 = vst.msk [vmem:[#allocation3 + $0x30] sm:$0xff] %vm904_vm5, %v1422_v4 }
0x1707   : > { %v1517_v33 = vld [vmem:[#allocation3 + $0x20] sm:$0xff] }
0x174d   : > { %v1721_v6 = vpop.f32.mrb[20].mxu1 }
0x174e   : > { %v1727_v7 = vadd.f32 %v1721_v6, %v1581_v5  ;;  %v2757_v8 = vpop.f32.mrb[21].mxu1 }
0x174f   : > { %v1724_v14 = vpop.f32.mrb[22].mxu1 }
0x1750   : > { %v1728_v59 = vmul.f32 %v1727_v7, %v3201_v32  ;;  %v2758_v9 = vpop.f32.mrb[23].mxu1 }
0x1752   : > { %2958 = vtanh.f32 %v1728_v59 }
0x175c   : > { %v2959_v16 = vpop.eup %2958 }
0x175d   : > { %v1730_v3 = vmul.f32 %v2959_v16, %v3201_v32 }
0x175f   : > { %v1731_v10 = vadd.f32 %v1730_v3, %v3205_v40 }
0x1761   : > { %1734 = vrot.lane.b32.xlu1 %v1731_v10, %s3014_s15  ;;  %v1732_v17 = vmul.f32 %v1731_v10, %v1672_v51 }
0x17d3   : > { %v1735_v12 = vpop.permute.xlu1 %1734 }
0x17d4   : > { %v1737_v13 = vmul.f32 %v1735_v12, %v1731_v10 }
0x17d6   : > { %1739 = vrot.lane.b32.xlu1 %v1737_v13, %s3015_s17 }
0x1848   : > { %v1740_v18 = vpop.permute.xlu1 %1739 }
0x1849   : > { %v1742_v20 = vadd.f32 %v1740_v18, %v1732_v17 }
0x184b   : > { %2960 = vtanh.f32 %v1742_v20 }
0x1855   : > { %v2961_v22 = vpop.eup %2960 }
0x1856   : > { %1745 = vrot.lane.b32.xlu1 %v2961_v22, %s3014_s15 }
0x185a   : > { %1346 = vrot.lane.b32.xlu1 %v3332_v39, %s3015_s17  ;;  %v1519_v39 = vld [vmem:[#allocation3 + $0x30] sm:$0xff] }
0x185e   : > { %1496 = vrot.lane.b32.xlu1 %v1494_v25, %s3015_s17 }
0x18c8   : > { %v1746_v28 = vpop.permute.xlu1 %1745 }
0x18c9   : > { %v1748_v23 = vmul.f32 %v1746_v28, %v1731_v10 }
0x18cb   : > { %v1750_v27 = vpack.c.bf16 %v1748_v23, %v1748_v23 }
0x18cc   : > { %v1347_v29 = vpop.permute.xlu1 %1346 }
0x18cd   : > { %1349 = vst.msk [vmem:[#allocation3 + $0x28] sm:$0xff] %vm904_vm5, %v1347_v29  ;;  %1752 = vrot.lane.b32.xlu0 %v1750_v27, %s3015_s17 }
0x18d0   : > { %v1497_v26 = vpop.permute.xlu1 %1496 }
0x18d1   : > { %1499 = vst.msk [vmem:[#allocation3 + $0x38] sm:$0xff] %vm904_vm5, %v1497_v26 }
0x18d4   : > { %v1518_v34 = vld [vmem:[#allocation3 + $0x28] sm:$0xff] }
0x18d5   : > { %v1523_v35 = vpack.c.bf16 %v1518_v34, %v1517_v33 }
0x18d7   : > { %2739 = vmatprep.mubr.msk.bf16.mxu0 %vm904_vm5, %v1523_v35 }
0x18d8   : > { %v1520_v36 = vld [vmem:[#allocation3 + $0x38] sm:$0xff] }
0x18d9   : > { %v1524_v37 = vpack.c.bf16 %v1520_v36, %v1519_v39 }
0x18db   : > { %2740 = vmatmul.mubr.msk.bf16.gmra.mrb[20].mxu0 %vm904_vm5, %v1524_v37 }
0x18dc   : > { %2763 = vmatprep.mubr.msk.bf16.mxu0 %vm3011_vm0, %v3010_v11 }
0x193f   : > { %v1753_v41 = vpop.permute.xlu0 %1752 }
0x1940   : > { %2764 = vmatmul.mubr.msk.bf16.vlgmr.msra.gmra.mrb[24].mxu0 %vm904_vm5, %v1753_v41 }
0x1941   : > { %2776 = vmatpush3.bf16.msra.mxu0 %v3385_v15  ;;  %2779 = vmatprep.mubr.msk.bf16.mxu0 %vm3011_vm0, %v3010_v11 }
0x1942   : > { %2777 = vmatprep.subr.bf16.mxu0 %v3010_v11 }
0x1945   : > { %2778 = vmatpush3.bf16.msra.mxu0 %v3396_v19 }
0x1946   : > { %2791 = vmatprep.subr.bf16.mxu0 %v3010_v11 }
0x19ae   : > { %v3476_v42 = vpop.f32.mrb[20].mxu0 }
0x19af   : > { %v3478_v43 = vpop.f32.mrb[21].mxu0 }
0x19b0   : > { %v3480_v44 = vpop.f32.mrb[22].mxu0  ;;  %v1594_v22 = vadd.f32 %v3421_v31, %v3478_v43 }
0x19b1   : > { %v3482_v45 = vpop.f32.mrb[23].mxu0 }
0x1a13   : > { %v1791_v47 = vpop.f32.mrb[24].mxu0 }
0x1a14   : > { %v1797_v48 = vadd.f32 %v1791_v47, %v1586_v46  ;;  %v2765_v49 = vpop.f32.mrb[25].mxu0 }
0x1a15   : > { %v1794_v50 = vpop.f32.mrb[26].mxu0 }
0x1a16   : > { %v1798_v51 = vmul.f32 %v1797_v48, %v3201_v32  ;;  %v2766_v52 = vpop.f32.mrb[27].mxu0 }
0x1a18   : > { %2962 = vtanh.f32 %v1798_v51  ;;  %v1597_v51 = vadd.f32 %v3421_v31, %v3482_v45 }
0x1a22   : > { %v2963_v53 = vpop.eup %2962 }
0x1a23   : > { %v1800_v54 = vmul.f32 %v2963_v53, %v3201_v32 }
0x1a25   : > { %v1801_v55 = vadd.f32 %v1800_v54, %v3205_v40 }
0x1a27   : > { %1804 = vrot.lane.b32.xlu1 %v1801_v55, %s3014_s15  ;;  %v1802_v21 = vmul.f32 %v1801_v55, %v1742_v20 }
0x1a99   : > { %v1805_v57 = vpop.permute.xlu1 %1804 }
0x1a9a   : > { %v1807_v60 = vmul.f32 %v1805_v57, %v1801_v55 }
0x1a9c   : > { %1809 = vrot.lane.b32.xlu0 %v1807_v60, %s3015_s17 }
0x1b0e   : > { %v1810_v30 = vpop.permute.xlu0 %1809 }
0x1b0f   : > { %v1812_v61 = vadd.f32 %v1810_v30, %v1802_v21 }
0x1b11   : > { %2964 = vtanh.f32 %v1812_v61 }
0x1b1b   : > { %v2965_v58 = vpop.eup %2964 }
0x1b1c   : > { %1815 = vrot.lane.b32.xlu1 %v2965_v58, %s3014_s15 }
0x1b8e   : > { %v1816_v38 = vpop.permute.xlu1 %1815 }
0x1b8f   : > { %v1818_v62 = vmul.f32 %v1816_v38, %v1801_v55 }
0x1b91   : > { %v1820_v63 = vpack.c.bf16 %v1818_v62, %v1818_v62 }
0x1b93   : > { %1822 = vrot.lane.b32.xlu0 %v1820_v63, %s3015_s17 }
0x1c05   : > { %v1823_v0 = vpop.permute.xlu0 %1822 }
0x1c06   : > { %2772 = vmatmul.mubr.msk.bf16.vlgmr.msra.gmra.mrb[24].mxu1 %vm904_vm5, %v1823_v0 }
0x1c07   : > { %2784 = vmatpush3.bf16.msra.mxu1 %v3385_v15  ;;  %2787 = vmatprep.mubr.msk.bf16.mxu1 %vm3011_vm0, %v3010_v11 }
0x1c08   : > { %2785 = vmatprep.subr.bf16.mxu1 %v3010_v11 }
0x1c0b   : > { %2786 = vmatpush3.bf16.msra.mxu1 %v3396_v19 }
0x1c0c   : > { %2799 = vmatprep.subr.bf16.mxu1 %v3010_v11 }
0x1cd9   : > { %v1861_v56 = vpop.f32.mrb[24].mxu1 }
0x1cda   : > { %v1867_v2 = vadd.f32 %v1861_v56, %v1589_v1  ;;  %v2773_v4 = vpop.f32.mrb[25].mxu1 }
0x1cdb   : > { %v1864_v5 = vpop.f32.mrb[26].mxu1 }
0x1cdc   : > { %v1868_v6 = vmul.f32 %v1867_v2, %v3201_v32  ;;  %v2774_v7 = vpop.f32.mrb[27].mxu1  ;;  %v1602_v2 = vadd.f32 %v3476_v42, %v3421_v31 }
0x1cde   : > { %2966 = vtanh.f32 %v1868_v6 }
0x1ce8   : > { %v2967_v8 = vpop.eup %2966 }
0x1ce9   : > { %v1870_v14 = vmul.f32 %v2967_v8, %v3201_v32 }
0x1ceb   : > { %v1871_v59 = vadd.f32 %v1870_v14, %v3205_v40 }
0x1ced   : > { %1874 = vrot.lane.b32.xlu1 %v1871_v59, %s3014_s15  ;;  %v1872_v24 = vmul.f32 %v1871_v59, %v1812_v61 }
0x1d5f   : > { %v1875_v9 = vpop.permute.xlu1 %1874 }
0x1d60   : > { %v1877_v16 = vmul.f32 %v1875_v9, %v1871_v59 }
0x1d62   : > { %1879 = vrot.lane.b32.xlu0 %v1877_v16, %s3015_s17 }
0x1dd4   : > { %v1880_v3 = vpop.permute.xlu0 %1879 }
0x1dd5   : > { %v1882_v10 = vadd.f32 %v1880_v3, %v1872_v24 }
0x1dd7   : > { %2968 = vtanh.f32 %v1882_v10 }
0x1de1   : > { %v2969_v12 = vpop.eup %2968 }
0x1de2   : > { %1885 = vrot.lane.b32.xlu1 %v2969_v12, %s3014_s15 }
0x1e54   : > { %v1886_v13 = vpop.permute.xlu1 %1885 }
0x1e55   : > { %v1888_v17 = vmul.f32 %v1886_v13, %v1871_v59 }
0x1e57   : > { %v1890_v18 = vpack.c.bf16 %v1888_v17, %v1888_v17 }
0x1e59   : > { %1892 = vrot.lane.b32.xlu0 %v1890_v18, %s3015_s17 }
0x1ecb   : > { %v1893_v20 = vpop.permute.xlu0 %1892 }
0x1ecc   : > { %2780 = vmatmul.mubr.msk.bf16.vlgmr.msra.gmra.mrb[28].mxu0 %vm904_vm5, %v1893_v20 }
0x1ecd   : > { %2792 = vmatpush3.bf16.msra.mxu0 %v3385_v15  ;;  %2795 = vmatprep.mubr.msk.bf16.mxu0 %vm3011_vm0, %v3010_v11 }
0x1ece   : > { %2793 = vmatprep.subr.bf16.mxu0 %v3010_v11 }
0x1ed1   : > { %2794 = vmatpush3.bf16.msra.mxu0 %v3396_v19 }
0x1f9f   : > { %v1931_v25 = vpop.f32.mrb[28].mxu0 }
0x1fa0   : > { %v1937_v28 = vadd.f32 %v1931_v25, %v1594_v22  ;;  %v2781_v23 = vpop.f32.mrb[29].mxu0  ;;  %v1605_v25 = vadd.f32 %v3480_v44, %v3421_v31 }
0x1fa1   : > { %v1934_v27 = vpop.f32.mrb[30].mxu0 }
0x1fa2   : > { %v1938_v29 = vmul.f32 %v1937_v28, %v3201_v32  ;;  %v2782_v26 = vpop.f32.mrb[31].mxu0 }
0x1fa4   : > { %2970 = vtanh.f32 %v1938_v29 }
0x1fae   : > { %v2971_v33 = vpop.eup %2970 }
0x1faf   : > { %v1940_v34 = vmul.f32 %v2971_v33, %v3201_v32 }
0x1fb1   : > { %v1941_v35 = vadd.f32 %v1940_v34, %v3205_v40 }
0x1fb3   : > { %1944 = vrot.lane.b32.xlu1 %v1941_v35, %s3014_s15  ;;  %v1942_v37 = vmul.f32 %v1941_v35, %v1882_v10 }
0x2025   : > { %v1945_v39 = vpop.permute.xlu1 %1944 }
0x2026   : > { %v1947_v36 = vmul.f32 %v1945_v39, %v1941_v35 }
0x2028   : > { %1949 = vrot.lane.b32.xlu0 %v1947_v36, %s3015_s17 }
0x209a   : > { %v1950_v41 = vpop.permute.xlu0 %1949 }
0x209b   : > { %v1952_v43 = vadd.f32 %v1950_v41, %v1942_v37 }
0x209d   : > { %2972 = vtanh.f32 %v1952_v43 }
0x20a7   : > { %v2973_v46 = vpop.eup %2972 }
0x20a8   : > { %1955 = vrot.lane.b32.xlu1 %v2973_v46, %s3014_s15  ;;  %v3016_v46 = vmov 0.0|0.0  }
0x20a9   : > { %2836 = vmatprep.subr.bf16.mxu0 %v3016_v46 }
0x211a   : > { %v1956_v47 = vpop.permute.xlu1 %1955 }
0x211b   : > { %v1958_v48 = vmul.f32 %v1956_v47, %v1941_v35 }
0x211d   : > { %v1960_v49 = vpack.c.bf16 %v1958_v48, %v1958_v48  ;;  %v2172_v48 = vld [vmem:[%s3628_s7 + $0x18] sm:$0xff] }
0x211f   : > { %1962 = vrot.lane.b32.xlu0 %v1960_v49, %s3015_s17 }
0x2191   : > { %v1963_v50 = vpop.permute.xlu0 %1962 }
0x2192   : > { %2788 = vmatmul.mubr.msk.bf16.vlgmr.msra.gmra.mrb[28].mxu1 %vm904_vm5, %v1963_v50 }
0x2193   : > { %2800 = vmatpush3.bf16.msra.mxu1 %v3385_v15  ;;  %2803 = vmatprep.mubr.msk.bf16.mxu1 %vm3011_vm0, %v3010_v11 }
0x2194   : > { %2801 = vmatprep.subr.bf16.mxu1 %v3010_v11 }
0x2197   : > { %2802 = vmatpush3.bf16.msra.mxu1 %v3396_v19 }
0x2198   : > { %2842 = vmatprep.subr.bf16.mxu1 %v3016_v46 }
0x2265   : > { %v2001_v52 = vpop.f32.mrb[28].mxu1 }
0x2266   : > { %v2007_v53 = vadd.f32 %v2001_v52, %v1597_v51  ;;  %v2789_v54 = vpop.f32.mrb[29].mxu1  ;;  %v2256_v51 = vld [vmem:[%s3630_s9] sm:$0xff]  ;;  %v2257_v52 = vld [vmem:[%s3630_s9 + $0x8] sm:$0xff] }
0x2267   : > { %v2004_v55 = vpop.f32.mrb[30].mxu1 }
0x2268   : > { %v2008_v57 = vmul.f32 %v2007_v53, %v3201_v32  ;;  %v2790_v60 = vpop.f32.mrb[31].mxu1  ;;  %v2843_v53 = vpack.c.bf16 %v2257_v52, %v2256_v51 }
0x2269   : > { %v2258_v60 = vld [vmem:[%s3630_s9 + $0x10] sm:$0xff] }
0x226a   : > { %2974 = vtanh.f32 %v2008_v57 }
0x2274   : > { %v2975_v21 = vpop.eup %2974 }
0x2275   : > { %v2010_v15 = vmul.f32 %v2975_v21, %v3201_v32  ;;  %v2259_v21 = vld [vmem:[%s3630_s9 + $0x18] sm:$0xff] }
0x2277   : > { %v2011_v30 = vadd.f32 %v2010_v15, %v3205_v40  ;;  %v2846_v15 = vpack.c.bf16 %v2259_v21, %v2258_v60 }
0x2279   : > { %2014 = vrot.lane.b32.xlu1 %v2011_v30, %s3014_s15  ;;  %v2012_v45 = vmul.f32 %v2011_v30, %v1952_v43  ;;  %v2169_v43 = vld [vmem:[%s3628_s7] sm:$0xff] }
0x22eb   : > { %v2015_v61 = vpop.permute.xlu1 %2014 }
0x22ec   : > { %v2017_v19 = vmul.f32 %v2015_v61, %v2011_v30 }
0x22ee   : > { %2019 = vrot.lane.b32.xlu0 %v2017_v19, %s3015_s17 }
0x2360   : > { %v2020_v58 = vpop.permute.xlu0 %2019 }
0x2361   : > { %v2022_v38 = vadd.f32 %v2020_v58, %v2012_v45  ;;  %v2341_v58 = vld [vmem:[%s3632_s11] sm:$0xff] }
0x2363   : > { %2976 = vtanh.f32 %v2022_v38 }
0x236d   : > { %v2977_v62 = vpop.eup %2976 }
0x236e   : > { %2025 = vrot.lane.b32.xlu1 %v2977_v62, %s3014_s15 }
0x23e0   : > { %v2026_v63 = vpop.permute.xlu1 %2025 }
0x23e1   : > { %v2028_v0 = vmul.f32 %v2026_v63, %v2011_v30  ;;  %v2528_v30 = vld [vmem:[%s3629_s8] ss:$0 sm:$0xff] }
0x23e2   : > { %v2530_v63 = vld [vmem:[%s3631_s10] ss:$0 sm:$0xff] }
0x23e3   : > { %v2030_v1 = vpack.c.bf16 %v2028_v0, %v2028_v0 }
0x23e5   : > { %2032 = vrot.lane.b32.xlu0 %v2030_v1, %s3015_s17 }
0x2457   : > { %v2033_v56 = vpop.permute.xlu0 %2032 }
0x2458   : > { %2796 = vmatmul.mubr.msk.bf16.vlgmr.msra.gmra.mrb[32].mxu0 %vm904_vm5, %v2033_v56 }
0x2459   : > { %2815 = vmatprep.mubr.msk.f32.mxu0 %vm3011_vm0, %v3010_v11 }
0x252b   : > { %v2071_v4 = vpop.f32.mrb[32].mxu0 }
0x252c   : > { %v2077_v5 = vadd.f32 %v2071_v4, %v1602_v2  ;;  %v2797_v6 = vpop.f32.mrb[33].mxu0  ;;  %v2532_v4 = vld [vmem:[#allocation4] ss:$0 sm:$0xff] }
0x252d   : > { %v2074_v7 = vpop.f32.mrb[34].mxu0 }
0x252e   : > { %v2078_v8 = vmul.f32 %v2077_v5, %v3201_v32  ;;  %v2798_v14 = vpop.f32.mrb[35].mxu0 }
0x2530   : > { %2978 = vtanh.f32 %v2078_v8 }
0x253a   : > { %v2979_v59 = vpop.eup %2978 }
0x253b   : > { %v2080_v9 = vmul.f32 %v2979_v59, %v3201_v32 }
0x253d   : > { %v2081_v16 = vadd.f32 %v2080_v9, %v3205_v40 }
0x253f   : > { %2084 = vrot.lane.b32.xlu1 %v2081_v16, %s3014_s15  ;;  %v2082_v42 = vmul.f32 %v2081_v16, %v2022_v38  ;;  %v2342_v38 = vld [vmem:[%s3632_s11 + $0x8] sm:$0xff] }
0x2540   : > { %v2849_v62 = vpack.c.bf16 %v2342_v38, %v2341_v58 }
0x25b1   : > { %v2085_v24 = vpop.permute.xlu1 %2084 }
0x25b2   : > { %v2087_v3 = vmul.f32 %v2085_v24, %v2081_v16 }
0x25b4   : > { %2089 = vrot.lane.b32.xlu0 %v2087_v3, %s3015_s17 }
0x2626   : > { %v2090_v10 = vpop.permute.xlu0 %2089 }
0x2627   : > { %v2092_v12 = vadd.f32 %v2090_v10, %v2082_v42 }
0x2629   : > { %2980 = vtanh.f32 %v2092_v12 }
0x2633   : > { %v2981_v13 = vpop.eup %2980 }
0x2634   : > { %2095 = vrot.lane.b32.xlu1 %v2981_v13, %s3014_s15 }
0x26a6   : > { %v2096_v17 = vpop.permute.xlu1 %2095 }
0x26a7   : > { %v2098_v18 = vmul.f32 %v2096_v17, %v2081_v16 }
0x26a9   : > { %v2100_v20 = vpack.c.bf16 %v2098_v18, %v2098_v18 }
0x26ab   : > { %2102 = vrot.lane.b32.xlu0 %v2100_v20, %s3015_s17 }
0x271d   : > { %v2103_v22 = vpop.permute.xlu0 %2102 }
0x271e   : > { %2804 = vmatmul.mubr.msk.bf16.vlgmr.msra.gmra.mrb[32].mxu1 %vm904_vm5, %v2103_v22 }
0x271f   : > { %2826 = vmatprep.mubr.msk.f32.mxu1 %vm3011_vm0, %v3010_v11  ;;  %2844 = vmatpush3.bf16.msra.mxu1 %v2843_v53 }
0x2720   : > { %2845 = vmatprep.subr.bf16.mxu1 %v3016_v46 }
0x2723   : > { %2847 = vmatpush3.bf16.msra.mxu1 %v2846_v15 }
0x27f1   : > { %v2141_v28 = vpop.f32.mrb[32].mxu1 }
0x27f2   : > { %v2147_v23 = vadd.f32 %v2141_v28, %v1605_v25  ;;  %v2805_v27 = vpop.f32.mrb[33].mxu1 }
0x27f3   : > { %v2144_v29 = vpop.f32.mrb[34].mxu1 }
0x27f4   : > { %v2148_v26 = vmul.f32 %v2147_v23, %v3201_v32  ;;  %v2806_v33 = vpop.f32.mrb[35].mxu1 }
0x27f6   : > { %2982 = vtanh.f32 %v2148_v26 }
0x2800   : > { %v2983_v34 = vpop.eup %2982 }
0x2801   : > { %v2150_v35 = vmul.f32 %v2983_v34, %v3201_v32  ;;  %v2170_v32 = vld [vmem:[%s3628_s7 + $0x8] sm:$0xff] }
0x2802   : > { %v2837_v47 = vpack.c.bf16 %v2170_v32, %v2169_v43 }
0x2803   : > { %v2151_v39 = vadd.f32 %v2150_v35, %v3205_v40  ;;  %v2171_v40 = vld [vmem:[%s3628_s7 + $0x10] sm:$0xff] }
0x2804   : > { %2838 = vmatpush3.bf16.msra.mxu0 %v2837_v47  ;;  %v2840_v49 = vpack.c.bf16 %v2172_v48, %v2171_v40 }
0x2805   : > { %2154 = vrot.lane.b32.xlu1 %v2151_v39, %s3014_s15  ;;  %v2152_v31 = vmul.f32 %v2151_v39, %v2092_v12  ;;  %2839 = vmatprep.subr.bf16.mxu0 %v3016_v46 }
0x2808   : > { %2841 = vmatpush3.bf16.msra.mxu0 %v2840_v49 }
0x2809   : > { %2848 = vmatprep.subr.bf16.mxu0 %v3016_v46 }
0x2877   : > { %v2155_v36 = vpop.permute.xlu1 %2154 }
0x2878   : > { %v2157_v37 = vmul.f32 %v2155_v36, %v2151_v39 }
0x287a   : > { %2159 = vrot.lane.b32.xlu0 %v2157_v37, %s3015_s17 }
0x28ec   : > { %v2160_v44 = vpop.permute.xlu0 %2159 }
0x28ed   : > { %v2162_v41 = vadd.f32 %v2160_v44, %v2152_v31 }
0x28ef   : > { %2984 = vtanh.f32 %v2162_v41 }
0x28f9   : > { %v2985_v50 = vpop.eup %2984 }
0x28fa   : > { %2165 = vrot.lane.b32.xlu1 %v2985_v50, %s3014_s15 }
0x296c   : > { %v2166_v54 = vpop.permute.xlu1 %2165 }
0x296d   : > { %v2168_v55 = vmul.f32 %v2166_v54, %v2151_v39 }
0x296f   : > { %2181 = vrot.lane.b32.xlu0 %v2168_v55, %s3015_s17 }
0x29e1   : > { %v2182_v57 = vpop.permute.xlu0 %2181 }
0x29e2   : > { %2816 = vmatmul.mubr.msk.f32.vlgmr.msra.gmra.mrb[36].mxu0 %vm904_vm5, %v2182_v57 }
0x29e3   : > { %2833 = vmatprep.mubr.msk.f32.mxu0 %vm3011_vm0, %v3010_v11  ;;  %2850 = vmatpush3.bf16.msra.mxu0 %v2849_v62 }
0x2ab5   : > { %v2251_v61 = vpop.f32.mrb[36].mxu0 }
0x2ab6   : > { %v2252_v19 = vadd.f32 %v2528_v30, %v2251_v61  ;;  %v2817_v45 = vpop.f32.mrb[37].mxu0 }
0x2ab8   : > { %v2255_v11 = vmax.f32 %v2252_v19, 0.0 }
0x2aba   : > { %2827 = vmatmul.mubr.msk.f32.vlgmr.msra.gmra.mrb[36].mxu1 %vm904_vm5, %v2255_v11 }
0x2b8d   : > { %v2336_v0 = vpop.f32.mrb[36].mxu1 }
0x2b8e   : > { %v2337_v1 = vadd.f32 %v2530_v63, %v2336_v0  ;;  %v2828_v56 = vpop.f32.mrb[37].mxu1 }
0x2b90   : > { %v2340_v2 = vmax.f32 %v2337_v1, 0.0 }
0x2b92   : > { %2834 = vmatmul.mubr.msk.f32.vlgmr.msra.gmra.mrb[38].mxu0 %vm529_vm1, %v2340_v2 }
0x2c65   : > { %v2419_v5 = vpop.f32.mrb[38].mxu0 }
0x2c66   : > { %v2420_v6 = vadd.f32 %v2532_v4, %v2419_v5  ;;  %v2835_v7 = vpop.f32.mrb[39].mxu0 }
0x2c68   : > { %2424 = vst.msk [vmem:[%s502_s26] sm:$0xff] %vm2423_vm6, %v2420_v6 }
0x2c69 PF: > { %p22_p9 = scmp.ge.s32.totalorder %s3107_s30, 4   ;;  %s3635_s27 = smov %s3004_s28 }
0x2c6a   : > { %s3636_s28 = smov %s3116_s16  ;;  %s3637_s29 = smov %s3107_s30 }
0x2c6b   :  { %24 = sbr.rel (!%p22_p9) target bundleno = 5 (0x5), region = 152 }

</bundles_post_ra>
